<compile_context>
chip_gen: v7x
topology: tpu7x:2x2x1
jax: 0.10.0
libtpu: 0.0.40
codegen_flags: <defaults>
</compile_context>

<pallas_src>
import math
from functools import partial

import jax
import jax.numpy as jnp
from jax import lax
from jax.experimental import pallas as pl
from jax.experimental.pallas import tpu as pltpu


# ----------------------------- fused kernel --------------------------------

def _encoder_stack_kernel(*refs, num_heads, num_layers, ffn_chunk,
                          has_attn_mask, has_self_kp, has_plm_kp):
    """One grid step == one batch element. Runs all `num_layers` shared-weight
    encoder layers on VMEM-resident activations (zero HBM traffic between
    layers; one output write per batch element)."""
    refs = list(refs)
    acat_ref = refs.pop()      # (T, E) f32 scratch: per-head attn-output concat
    x_scr = refs.pop()         # (T, E) f32 scratch: running residual stream
    o_ref = refs.pop()         # (1, T, E) output block
    it = iter(refs)
    x_ref, plm_ref = next(it), next(it)
    amask_ref = next(it) if has_attn_mask else None
    kps_ref = next(it) if has_self_kp else None
    kpp_ref = next(it) if has_plm_kp else None
    (w_qkv_ref, b_qkv_ref, w_o_ref, b_o_ref,
     w_q2_ref, b_q2_ref, w_kv2_ref, b_kv2_ref, w_o2_ref, b_o2_ref,
     w1_ref, b1_ref, w2_ref, b2_ref) = it

    f32, bf16 = jnp.float32, jnp.bfloat16
    T, E = x_scr.shape
    plm = plm_ref[0]                     # (S, P) f32
    S = plm.shape[0]
    H = num_heads
    Dh = E // H

    # --- additive attention biases, built ONCE (hoisted out of layer loop) ---
    bias_self = amask_ref[...] if has_attn_mask else None          # (T, T)
    if has_self_kp:
        kb = jnp.broadcast_to(kps_ref[0], (T, T))
        bias_self = kb if bias_self is None else bias_self + kb
    bias_plm = jnp.broadcast_to(kpp_ref[0], (T, S)) if has_plm_kp else None

    # --- cross ("outside") attention K/V depend only on plm_out: compute ONCE,
    #     reuse across all 6 layers (fused K|V projection, bf16 on the MXU). ---
    kv2 = jnp.dot(plm.astype(bf16), w_kv2_ref[...],
                  preferred_element_type=f32) + b_kv2_ref[...]     # (S, 2E) f32
    k2 = kv2[:, :E].astype(bf16)
    v2 = kv2[:, E:].astype(bf16)

    def mha_proj(q, k_bf, v_bf, bias, w_out_ref, b_out_ref):
        """Multi-head attention fused with the output projection.
        Per-head scores/softmax (f32), head outputs staged into the (T, E)
        scratch, then ONE (T,E)@(E,E) bf16 matmul (deep MXU contraction)."""
        q_bf = q.astype(bf16)
        for h in range(H):
            sl = slice(h * Dh, (h + 1) * Dh)
            # QK^T via dot_general contracting last axes: no XLU transpose.
            s = lax.dot_general(q_bf[:, sl], k_bf[:, sl],
                                (((1,), (1,)), ((), ())),
                                preferred_element_type=f32)        # (T, S)
            if bias is not None:
                s = s + bias
            s = s - jnp.max(s, axis=-1, keepdims=True)
            p = jnp.exp(s)
            p = p * pl.reciprocal(jnp.sum(p, axis=-1, keepdims=True), approx=True)
            acat_ref[:, sl] = jnp.dot(p.astype(bf16), v_bf[:, sl],
                                      preferred_element_type=f32)  # (T, Dh)
        return jnp.dot(acat_ref[...].astype(bf16), w_out_ref[...],
                       preferred_element_type=f32) + b_out_ref[...]

    x_scr[...] = x_ref[0]

    @pl.loop(0, num_layers)
    def _layer(_):
        xc = x_scr[...]                  # (T, E) f32 residual stream
        xc_bf = xc.astype(bf16)
        # Fused QKV projection; Q columns/bias pre-scaled by 1/sqrt(Dh).
        qkv = jnp.dot(xc_bf, w_qkv_ref[...],
                      preferred_element_type=f32) + b_qkv_ref[...]  # (T, 3E)
        x1 = mha_proj(qkv[:, :E], qkv[:, E:2 * E].astype(bf16),
                      qkv[:, 2 * E:].astype(bf16), bias_self, w_o_ref, b_o_ref)
        # Cross attention against the precomputed plm K/V (Q pre-scaled too).
        q2 = jnp.dot(xc_bf, w_q2_ref[...],
                     preferred_element_type=f32) + b_q2_ref[...]
        x2 = mha_proj(q2, k2, v2, bias_plm, w_o2_ref, b_o2_ref)
        # dropnet (eval) = [0.5, 0.5]; dropout modules are identity in eval.
        xmid = xc + 0.5 * x1 + 0.5 * x2
        # FFN with residual (quant_noise p=0 -> identity); token-dim chunked so
        # the (chunk, F) intermediate stays bounded at large T/F (v7x 64 MiB).
        if T <= ffn_chunk:
            hdn = jnp.maximum(
                jnp.dot(xmid.astype(bf16), w1_ref[...],
                        preferred_element_type=f32) + b1_ref[...], 0.0)
            x_scr[...] = xmid + (jnp.dot(hdn.astype(bf16), w2_ref[...],
                                         preferred_element_type=f32)
                                 + b2_ref[...])
        else:
            for t0 in range(0, T, ffn_chunk):
                t1 = min(t0 + ffn_chunk, T)
                xm_c = xmid[t0:t1]
                hdn = jnp.maximum(
                    jnp.dot(xm_c.astype(bf16), w1_ref[...],
                            preferred_element_type=f32) + b1_ref[...], 0.0)
                x_scr[t0:t1, :] = xm_c + (jnp.dot(hdn.astype(bf16), w2_ref[...],
                                                  preferred_element_type=f32)
                                          + b2_ref[...])

    o_ref[0] = x_scr[...]


# ------------------------------- wrapper ------------------------------------

def _concat_params(p, E, num_heads):
    """Fuse per-attention weights once (Q|K|V -> (E,3E), K|V -> (P,2E)), fold
    the 1/sqrt(Dh) attention scaling into the Q weights/bias, and cast matmul
    weights to bf16 (halves weight VMEM / DMA; f32 biases for f32 accum)."""
    scaling = 1.0 / math.sqrt(E // num_heads)
    sa, oa = p["self_attn"], p["outside_attn"]
    F = p["fc1_w"].shape[1]
    bf16, f32 = jnp.bfloat16, jnp.float32
    w_qkv = jnp.concatenate([sa["q_w"] * scaling, sa["k_w"], sa["v_w"]], axis=1)
    b_qkv = jnp.concatenate([sa["q_b"] * scaling, sa["k_b"], sa["v_b"]])
    return dict(
        w_qkv=w_qkv.astype(bf16), b_qkv=b_qkv.reshape(1, 3 * E).astype(f32),
        w_o=sa["out_w"].astype(bf16), b_o=sa["out_b"].reshape(1, E).astype(f32),
        w_q2=(oa["q_w"] * scaling).astype(bf16),
        b_q2=(oa["q_b"] * scaling).reshape(1, E).astype(f32),
        w_kv2=jnp.concatenate([oa["k_w"], oa["v_w"]], axis=1).astype(bf16),
        b_kv2=jnp.concatenate([oa["k_b"], oa["v_b"]]).reshape(1, 2 * E).astype(f32),
        w_o2=oa["out_w"].astype(bf16), b_o2=oa["out_b"].reshape(1, E).astype(f32),
        w1=p["fc1_w"].astype(bf16), b1=p["fc1_b"].reshape(1, F).astype(f32),
        w2=p["fc2_w"].astype(bf16), b2=p["fc2_b"].reshape(1, E).astype(f32),
    )


def encoder_layers(params, x_bte, plm_bsp, *, num_heads, num_layers,
                   attn_mask=None, encoder_padding_mask=None,
                   plm_padding_mask=None, ffn_chunk=512):
    """Runs `num_layers` shared-weight EncoderLayers in ONE fused pallas_call.

    x_bte: (B, T, E) float (batch-first), plm_bsp: (B, S, plm_dim) float.
    Masks (all None in Encoder.forward) are converted to small additive biases;
    when None the corresponding inputs/adds are compiled out entirely.
    """
    B, T, E = x_bte.shape
    _, S, P = plm_bsp.shape
    if E % num_heads != 0:
        raise ValueError("embed_dim must be divisible by num_heads")

    cp = _concat_params(params, E, num_heads)
    F = cp["w1"].shape[1]

    has_attn_mask = attn_mask is not None
    has_self_kp = encoder_padding_mask is not None
    has_plm_kp = plm_padding_mask is not None

    def full(shape):
        return pl.BlockSpec(shape, lambda b, _n=len(shape): (0,) * _n)

    def per_b(d1, d2):
        return pl.BlockSpec((1, d1, d2), lambda b: (b, 0, 0))

    inputs = [x_bte.astype(jnp.float32), plm_bsp.astype(jnp.float32)]
    in_specs = [per_b(T, E), per_b(S, P)]
    if has_attn_mask:
        # Reference: attn_mask.masked_fill(attn_mask.bool(), -1e8), added to scores.
        inputs.append(jnp.where(attn_mask.astype(bool), jnp.float32(-1e8),
                                attn_mask.astype(jnp.float32)))
        in_specs.append(full((T, T)))
    if has_self_kp:
        # Finite -1e9 (instead of -inf) to avoid NaN on fully-padded rows.
        inputs.append(jnp.where(encoder_padding_mask[:, None, :], -1e9, 0.0
                                ).astype(jnp.float32))
        in_specs.append(per_b(1, T))
    if has_plm_kp:
        inputs.append(jnp.where(plm_padding_mask[:, None, :], -1e9, 0.0
                                ).astype(jnp.float32))
        in_specs.append(per_b(1, S))

    for name in ("w_qkv", "b_qkv", "w_o", "b_o", "w_q2", "b_q2",
                 "w_kv2", "b_kv2", "w_o2", "b_o2", "w1", "b1", "w2", "b2"):
        inputs.append(cp[name])
        in_specs.append(full(cp[name].shape))

    # Explicit VMEM budget (v5e scoped default is 16 MiB; v6e/v7x 32 MiB).
    weight_bytes = sum(int(v.size) * v.dtype.itemsize for v in cp.values())
    act_bytes = 4 * (2 * T * E + S * P)                       # x/out/plm blocks
    interm_bytes = 4 * (T * 3 * E + S * 2 * E + min(T, ffn_chunk) * F
                        + 4 * T * max(T, S) + 4 * T * E)
    vmem_limit = int(min(max(2 * (weight_bytes + act_bytes) + interm_bytes
                             + (8 << 20), 32 << 20), 100 << 20))

    kernel = partial(_encoder_stack_kernel, num_heads=num_heads,
                     num_layers=num_layers, ffn_chunk=ffn_chunk,
                     has_attn_mask=has_attn_mask, has_self_kp=has_self_kp,
                     has_plm_kp=has_plm_kp)

    # TODO(synk): for B == 1 on v7x one TensorCore idles; a second "parallel"
    # grid axis over T-halves would be needed to feed both cores.
    return pl.pallas_call(
        kernel,
        grid=(B,),
        out_shape=jax.ShapeDtypeStruct((B, T, E), jnp.float32),
        in_specs=in_specs,
        out_specs=per_b(T, E),
        scratch_shapes=[pltpu.VMEM((T, E), jnp.float32),    # running activation
                        pltpu.VMEM((T, E), jnp.float32)],   # head-concat buffer
        compiler_params=pltpu.CompilerParams(
            dimension_semantics=("parallel",),
            vmem_limit_bytes=vmem_limit),
    )(*inputs)


def encoder_forward(params, embedding_input, plm_input, *, num_heads=4,
                    num_layers=6):
    """Mirrors Encoder.forward (eval). embedding_input: (B, T, E) float,
    plm_input: (S_plm, B, plm_dim) seq-first (nn.MultiheadAttention layout)."""
    # encoder_padding_mask = embedding_input.eq(padding_idx=0); the reference
    # computes it but never feeds it to the layers (passes None) -- mirrored.
    encoder_padding_mask = (embedding_input == 0)

    x_bte = embedding_input.astype(jnp.float32)                  # batch-first
    plm_bsp = jnp.transpose(plm_input, (1, 0, 2)).astype(jnp.float32)

    # All 6 layers share the SAME EncoderLayer weights -> one fused kernel.
    x_bte = encoder_layers(params, x_bte, plm_bsp,
                           num_heads=num_heads, num_layers=num_layers)

    x_tbe = jnp.transpose(x_bte, (1, 0, 2))   # reference encoder_out is (T,B,E)
    # TODO(synk): return_all_hiddens would need per-layer outputs, which the
    # fully fused kernel does not emit; only the final state is returned.
    return {
        "encoder_out": [x_tbe],
        "encoder_padding_mask": [encoder_padding_mask],
        "plm_out": [plm_input],
        "plm_padding_mask": [],
        "encoder_states": [],
        "src_tokens": [],
        "src_lengths": [],
    }


# ------------------------ deterministic param init --------------------------

def _lin_init(key, din, dout):
    kw, kb = jax.random.split(key)
    s = 1.0 / math.sqrt(din)
    w = jax.random.normal(kw, (din, dout), jnp.float32) * s   # stored (Din, Dout)
    b = jax.random.normal(kb, (dout,), jnp.float32) * 0.02
    return w, b


def init_params(key, embed_dim, ffn_dim, plm_dim):
    ks = jax.random.split(key, 10)
    sa = {}
    sa["q_w"], sa["q_b"] = _lin_init(ks[0], embed_dim, embed_dim)
    sa["k_w"], sa["k_b"] = _lin_init(ks[1], embed_dim, embed_dim)
    sa["v_w"], sa["v_b"] = _lin_init(ks[2], embed_dim, embed_dim)
    sa["out_w"], sa["out_b"] = _lin_init(ks[3], embed_dim, embed_dim)
    oa = {}
    oa["q_w"], oa["q_b"] = _lin_init(ks[4], embed_dim, embed_dim)
    oa["k_w"], oa["k_b"] = _lin_init(ks[5], plm_dim, embed_dim)
    oa["v_w"], oa["v_b"] = _lin_init(ks[6], plm_dim, embed_dim)
    oa["out_w"], oa["out_b"] = _lin_init(ks[7], embed_dim, embed_dim)
    p = {"self_attn": sa, "outside_attn": oa}
    p["fc1_w"], p["fc1_b"] = _lin_init(ks[8], embed_dim, ffn_dim)
    p["fc2_w"], p["fc2_b"] = _lin_init(ks[9], ffn_dim, embed_dim)
    return p


# ---------------------------------- main ------------------------------------

if __name__ == "__main__":
    T, B, E, H, F = 8, 2, 32, 4, 64          # seq, batch, embed, heads, ffn
    S_PLM, PLM_DIM = 8, 48                   # plm encoder output seq / dim
    NUM_LAYERS = 6                           # Encoder stacks the same layer 6x

    key = jax.random.PRNGKey(0)
    kx, kplm, kparams = jax.random.split(key, 3)

    embedding_input = jax.random.normal(kx, (B, T, E), jnp.float32)
    plm_input = jax.random.normal(kplm, (S_PLM, B, PLM_DIM), jnp.float32)
    params = init_params(kparams, E, F, PLM_DIM)

    fwd = jax.jit(lambda p, x, plm: encoder_forward(
        p, x, plm, num_heads=H, num_layers=NUM_LAYERS))
    out = fwd(params, embedding_input, plm_input)
    x_out = jax.block_until_ready(out["encoder_out"][0])

    assert x_out.shape == (T, B, E), x_out.shape
    assert bool(jnp.all(jnp.isfinite(x_out)))
    print("KERNEL_OK")
</pallas_src>

<mosaic_0001>
module attributes {stable_mosaic.version = 11 : i64} {
  func.func @_encoder_stack_kernel(%arg0: i32, %arg1: memref<1x8x32xf32, #tpu.memory_space<vmem>>, %arg2: memref<1x8x48xf32, #tpu.memory_space<vmem>>, %arg3: memref<32x96xbf16, #tpu.memory_space<vmem>>, %arg4: memref<1x96xf32, #tpu.memory_space<vmem>>, %arg5: memref<32x32xbf16, #tpu.memory_space<vmem>>, %arg6: memref<1x32xf32, #tpu.memory_space<vmem>>, %arg7: memref<32x32xbf16, #tpu.memory_space<vmem>>, %arg8: memref<1x32xf32, #tpu.memory_space<vmem>>, %arg9: memref<48x64xbf16, #tpu.memory_space<vmem>>, %arg10: memref<1x64xf32, #tpu.memory_space<vmem>>, %arg11: memref<32x32xbf16, #tpu.memory_space<vmem>>, %arg12: memref<1x32xf32, #tpu.memory_space<vmem>>, %arg13: memref<32x64xbf16, #tpu.memory_space<vmem>>, %arg14: memref<1x64xf32, #tpu.memory_space<vmem>>, %arg15: memref<64x32xbf16, #tpu.memory_space<vmem>>, %arg16: memref<1x32xf32, #tpu.memory_space<vmem>>, %arg17: memref<1x8x32xf32, #tpu.memory_space<vmem>>, %arg18: memref<8x32xf32, #tpu.memory_space<vmem>>, %arg19: memref<8x32xf32, #tpu.memory_space<vmem>>) attributes {dimension_semantics = [#tpu.dimension_semantics<parallel>], iteration_bounds = array<i64: 2>, scalar_prefetch = 0 : i64, scratch_operands = 2 : i64, tpu.core_type = #tpu.core_type<tc>, window_params = [{transform_indices = @transform_0, window_bounds = array<i64: 1, 8, 32>}, {transform_indices = @transform_1, window_bounds = array<i64: 1, 8, 48>}, {pipeline_mode = #tpu.pipeline_mode<synchronous>, transform_indices = @transform_2, window_bounds = array<i64: 32, 96>}, {pipeline_mode = #tpu.pipeline_mode<synchronous>, transform_indices = @transform_3, window_bounds = array<i64: 1, 96>}, {pipeline_mode = #tpu.pipeline_mode<synchronous>, transform_indices = @transform_4, window_bounds = array<i64: 32, 32>}, {pipeline_mode = #tpu.pipeline_mode<synchronous>, transform_indices = @transform_5, window_bounds = array<i64: 1, 32>}, {pipeline_mode = #tpu.pipeline_mode<synchronous>, transform_indices = @transform_6, window_bounds = array<i64: 32, 32>}, {pipeline_mode = #tpu.pipeline_mode<synchronous>, transform_indices = @transform_7, window_bounds = array<i64: 1, 32>}, {pipeline_mode = #tpu.pipeline_mode<synchronous>, transform_indices = @transform_8, window_bounds = array<i64: 48, 64>}, {pipeline_mode = #tpu.pipeline_mode<synchronous>, transform_indices = @transform_9, window_bounds = array<i64: 1, 64>}, {pipeline_mode = #tpu.pipeline_mode<synchronous>, transform_indices = @transform_10, window_bounds = array<i64: 32, 32>}, {pipeline_mode = #tpu.pipeline_mode<synchronous>, transform_indices = @transform_11, window_bounds = array<i64: 1, 32>}, {pipeline_mode = #tpu.pipeline_mode<synchronous>, transform_indices = @transform_12, window_bounds = array<i64: 32, 64>}, {pipeline_mode = #tpu.pipeline_mode<synchronous>, transform_indices = @transform_13, window_bounds = array<i64: 1, 64>}, {pipeline_mode = #tpu.pipeline_mode<synchronous>, transform_indices = @transform_14, window_bounds = array<i64: 64, 32>}, {pipeline_mode = #tpu.pipeline_mode<synchronous>, transform_indices = @transform_15, window_bounds = array<i64: 1, 32>}, {transform_indices = @transform_16, window_bounds = array<i64: 1, 8, 32>}]} {
    %c0 = arith.constant 0 : index
    %c0_0 = arith.constant 0 : index
    %c0_1 = arith.constant 0 : index
    %0 = vector.load %arg2[%c0, %c0_0, %c0_1] : memref<1x8x48xf32, #tpu.memory_space<vmem>>, vector<1x8x48xf32>
    %1 = vector.shape_cast %0 : vector<1x8x48xf32> to vector<8x48xf32>
    %2 = arith.truncf %1 : vector<8x48xf32> to vector<8x48xbf16>
    %c0_2 = arith.constant 0 : index
    %c0_3 = arith.constant 0 : index
    %3 = vector.load %arg9[%c0_2, %c0_3] : memref<48x64xbf16, #tpu.memory_space<vmem>>, vector<48x64xbf16>
    %cst = arith.constant dense<0.000000e+00> : vector<8x64xf32>
    %4 = tpu.matmul %2, %3, %cst {dimension_numbers = #tpu.dot_dimension_numbers<[1], [0], [0], [1], [0, 0, 1, 1], [], []>} : vector<8x48xbf16>, vector<48x64xbf16>, vector<8x64xf32> -> vector<8x64xf32>
    %c0_4 = arith.constant 0 : index
    %c0_5 = arith.constant 0 : index
    %5 = vector.load %arg10[%c0_4, %c0_5] : memref<1x64xf32, #tpu.memory_space<vmem>>, vector<1x64xf32>
    %6 = vector.broadcast %5 : vector<1x64xf32> to vector<8x64xf32>
    %7 = arith.addf %4, %6 : vector<8x64xf32>
    %8 = vector.extract_strided_slice %7 {offsets = [0, 0], sizes = [8, 32], strides = [1, 1]} : vector<8x64xf32> to vector<8x32xf32>
    %9 = arith.truncf %8 : vector<8x32xf32> to vector<8x32xbf16>
    %10 = vector.extract_strided_slice %7 {offsets = [0, 32], sizes = [8, 32], strides = [1, 1]} : vector<8x64xf32> to vector<8x32xf32>
    %11 = arith.truncf %10 : vector<8x32xf32> to vector<8x32xbf16>
    %c0_6 = arith.constant 0 : index
    %c0_7 = arith.constant 0 : index
    %c0_8 = arith.constant 0 : index
    %12 = vector.load %arg1[%c0_6, %c0_7, %c0_8] : memref<1x8x32xf32, #tpu.memory_space<vmem>>, vector<1x8x32xf32>
    %13 = vector.shape_cast %12 : vector<1x8x32xf32> to vector<8x32xf32>
    %c0_9 = arith.constant 0 : index
    %c0_10 = arith.constant 0 : index
    %14 = vector.load %arg18[%c0_9, %c0_10] : memref<8x32xf32, #tpu.memory_space<vmem>>, vector<8x32xf32>
    tpu.vector_store %arg18[%c0_9, %c0_10], %13 {strides = array<i32>} : memref<8x32xf32, #tpu.memory_space<vmem>>, vector<8x32xf32>,
    %c0_i32 = arith.constant 0 : i32
    %c6_i32 = arith.constant 6 : i32
    %15 = arith.addi %c0_i32, %c6_i32 : i32
    %c1_i32 = arith.constant 1 : i32
    scf.for %arg20 = %c0_i32 to %15 step %c1_i32  : i32 {
      %c0_16 = arith.constant 0 : index
      %c0_17 = arith.constant 0 : index
      %20 = vector.load %arg18[%c0_16, %c0_17] : memref<8x32xf32, #tpu.memory_space<vmem>>, vector<8x32xf32>
      %21 = arith.truncf %20 : vector<8x32xf32> to vector<8x32xbf16>
      %c0_18 = arith.constant 0 : index
      %c0_19 = arith.constant 0 : index
      %22 = vector.load %arg3[%c0_18, %c0_19] : memref<32x96xbf16, #tpu.memory_space<vmem>>, vector<32x96xbf16>
      %cst_20 = arith.constant dense<0.000000e+00> : vector<8x96xf32>
      %23 = tpu.matmul %21, %22, %cst_20 {dimension_numbers = #tpu.dot_dimension_numbers<[1], [0], [0], [1], [0, 0, 1, 1], [], []>} : vector<8x32xbf16>, vector<32x96xbf16>, vector<8x96xf32> -> vector<8x96xf32>
      %c0_21 = arith.constant 0 : index
      %c0_22 = arith.constant 0 : index
      %24 = vector.load %arg4[%c0_21, %c0_22] : memref<1x96xf32, #tpu.memory_space<vmem>>, vector<1x96xf32>
      %25 = vector.broadcast %24 : vector<1x96xf32> to vector<8x96xf32>
      %26 = arith.addf %23, %25 : vector<8x96xf32>
      %27 = vector.extract_strided_slice %26 {offsets = [0, 0], sizes = [8, 32], strides = [1, 1]} : vector<8x96xf32> to vector<8x32xf32>
      %28 = vector.extract_strided_slice %26 {offsets = [0, 32], sizes = [8, 32], strides = [1, 1]} : vector<8x96xf32> to vector<8x32xf32>
      %29 = arith.truncf %28 : vector<8x32xf32> to vector<8x32xbf16>
      %30 = vector.extract_strided_slice %26 {offsets = [0, 64], sizes = [8, 32], strides = [1, 1]} : vector<8x96xf32> to vector<8x32xf32>
      %31 = arith.truncf %30 : vector<8x32xf32> to vector<8x32xbf16>
      %32 = arith.truncf %27 : vector<8x32xf32> to vector<8x32xbf16>
      %33 = vector.extract_strided_slice %32 {offsets = [0, 0], sizes = [8, 8], strides = [1, 1]} : vector<8x32xbf16> to vector<8x8xbf16>
      %34 = vector.extract_strided_slice %29 {offsets = [0, 0], sizes = [8, 8], strides = [1, 1]} : vector<8x32xbf16> to vector<8x8xbf16>
      %cst_23 = arith.constant dense<0.000000e+00> : vector<8x8xf32>
      %35 = tpu.matmul %33, %34, %cst_23 {dimension_numbers = #tpu.dot_dimension_numbers<[1], [1], [0], [0], [0, 0, 1, 0], [], []>} : vector<8x8xbf16>, vector<8x8xbf16>, vector<8x8xf32> -> vector<8x8xf32>
      %cst_24 = arith.constant dense<0xFF800000> : vector<8xf32>
      %36 = vector.multi_reduction <maximumf>, %35, %cst_24 [1] : vector<8x8xf32> to vector<8xf32>
      %37 = vector.shape_cast %36 : vector<8xf32> to vector<8x1xf32>
      %38 = vector.broadcast %37 : vector<8x1xf32> to vector<8x8xf32>
      %39 = arith.subf %35, %38 : vector<8x8xf32>
      %40 = math.exp %39 : vector<8x8xf32>
      %cst_25 = arith.constant dense<0.000000e+00> : vector<8xf32>
      %41 = vector.multi_reduction <add>, %40, %cst_25 [1] : vector<8x8xf32> to vector<8xf32>
      %42 = vector.shape_cast %41 : vector<8xf32> to vector<8x1xf32>
      %43 = tpu.reciprocal %42 {approx = true} : vector<8x1xf32> -> vector<8x1xf32>
      %44 = vector.broadcast %43 : vector<8x1xf32> to vector<8x8xf32>
      %45 = arith.mulf %40, %44 : vector<8x8xf32>
      %46 = arith.truncf %45 : vector<8x8xf32> to vector<8x8xbf16>
      %47 = vector.extract_strided_slice %31 {offsets = [0, 0], sizes = [8, 8], strides = [1, 1]} : vector<8x32xbf16> to vector<8x8xbf16>
      %cst_26 = arith.constant dense<0.000000e+00> : vector<8x8xf32>
      %48 = tpu.matmul %46, %47, %cst_26 {dimension_numbers = #tpu.dot_dimension_numbers<[1], [0], [0], [1], [0, 0, 1, 1], [], []>} : vector<8x8xbf16>, vector<8x8xbf16>, vector<8x8xf32> -> vector<8x8xf32>
      %c0_27 = arith.constant 0 : index
      %c0_28 = arith.constant 0 : index
      %49 = vector.load %arg19[%c0_27, %c0_28] : memref<8x32xf32, #tpu.memory_space<vmem>>, vector<8x8xf32>
      tpu.vector_store %arg19[%c0_27, %c0_28], %48 {strides = array<i32>} : memref<8x32xf32, #tpu.memory_space<vmem>>, vector<8x8xf32>,
      %50 = vector.extract_strided_slice %32 {offsets = [0, 8], sizes = [8, 8], strides = [1, 1]} : vector<8x32xbf16> to vector<8x8xbf16>
      %51 = vector.extract_strided_slice %29 {offsets = [0, 8], sizes = [8, 8], strides = [1, 1]} : vector<8x32xbf16> to vector<8x8xbf16>
      %cst_29 = arith.constant dense<0.000000e+00> : vector<8x8xf32>
      %52 = tpu.matmul %50, %51, %cst_29 {dimension_numbers = #tpu.dot_dimension_numbers<[1], [1], [0], [0], [0, 0, 1, 0], [], []>} : vector<8x8xbf16>, vector<8x8xbf16>, vector<8x8xf32> -> vector<8x8xf32>
      %cst_30 = arith.constant dense<0xFF800000> : vector<8xf32>
      %53 = vector.multi_reduction <maximumf>, %52, %cst_30 [1] : vector<8x8xf32> to vector<8xf32>
      %54 = vector.shape_cast %53 : vector<8xf32> to vector<8x1xf32>
      %55 = vector.broadcast %54 : vector<8x1xf32> to vector<8x8xf32>
      %56 = arith.subf %52, %55 : vector<8x8xf32>
      %57 = math.exp %56 : vector<8x8xf32>
      %cst_31 = arith.constant dense<0.000000e+00> : vector<8xf32>
      %58 = vector.multi_reduction <add>, %57, %cst_31 [1] : vector<8x8xf32> to vector<8xf32>
      %59 = vector.shape_cast %58 : vector<8xf32> to vector<8x1xf32>
      %60 = tpu.reciprocal %59 {approx = true} : vector<8x1xf32> -> vector<8x1xf32>
      %61 = vector.broadcast %60 : vector<8x1xf32> to vector<8x8xf32>
      %62 = arith.mulf %57, %61 : vector<8x8xf32>
      %63 = arith.truncf %62 : vector<8x8xf32> to vector<8x8xbf16>
      %64 = vector.extract_strided_slice %31 {offsets = [0, 8], sizes = [8, 8], strides = [1, 1]} : vector<8x32xbf16> to vector<8x8xbf16>
      %cst_32 = arith.constant dense<0.000000e+00> : vector<8x8xf32>
      %65 = tpu.matmul %63, %64, %cst_32 {dimension_numbers = #tpu.dot_dimension_numbers<[1], [0], [0], [1], [0, 0, 1, 1], [], []>} : vector<8x8xbf16>, vector<8x8xbf16>, vector<8x8xf32> -> vector<8x8xf32>
      %c0_33 = arith.constant 0 : index
      %c8 = arith.constant 8 : index
      %66 = vector.load %arg19[%c0_33, %c8] : memref<8x32xf32, #tpu.memory_space<vmem>>, vector<8x8xf32>
      tpu.vector_store %arg19[%c0_33, %c8], %65 {strides = array<i32>} : memref<8x32xf32, #tpu.memory_space<vmem>>, vector<8x8xf32>,
      %67 = vector.extract_strided_slice %32 {offsets = [0, 16], sizes = [8, 8], strides = [1, 1]} : vector<8x32xbf16> to vector<8x8xbf16>
      %68 = vector.extract_strided_slice %29 {offsets = [0, 16], sizes = [8, 8], strides = [1, 1]} : vector<8x32xbf16> to vector<8x8xbf16>
      %cst_34 = arith.constant dense<0.000000e+00> : vector<8x8xf32>
      %69 = tpu.matmul %67, %68, %cst_34 {dimension_numbers = #tpu.dot_dimension_numbers<[1], [1], [0], [0], [0, 0, 1, 0], [], []>} : vector<8x8xbf16>, vector<8x8xbf16>, vector<8x8xf32> -> vector<8x8xf32>
      %cst_35 = arith.constant dense<0xFF800000> : vector<8xf32>
      %70 = vector.multi_reduction <maximumf>, %69, %cst_35 [1] : vector<8x8xf32> to vector<8xf32>
      %71 = vector.shape_cast %70 : vector<8xf32> to vector<8x1xf32>
      %72 = vector.broadcast %71 : vector<8x1xf32> to vector<8x8xf32>
      %73 = arith.subf %69, %72 : vector<8x8xf32>
      %74 = math.exp %73 : vector<8x8xf32>
      %cst_36 = arith.constant dense<0.000000e+00> : vector<8xf32>
      %75 = vector.multi_reduction <add>, %74, %cst_36 [1] : vector<8x8xf32> to vector<8xf32>
      %76 = vector.shape_cast %75 : vector<8xf32> to vector<8x1xf32>
      %77 = tpu.reciprocal %76 {approx = true} : vector<8x1xf32> -> vector<8x1xf32>
      %78 = vector.broadcast %77 : vector<8x1xf32> to vector<8x8xf32>
      %79 = arith.mulf %74, %78 : vector<8x8xf32>
      %80 = arith.truncf %79 : vector<8x8xf32> to vector<8x8xbf16>
      %81 = vector.extract_strided_slice %31 {offsets = [0, 16], sizes = [8, 8], strides = [1, 1]} : vector<8x32xbf16> to vector<8x8xbf16>
      %cst_37 = arith.constant dense<0.000000e+00> : vector<8x8xf32>
      %82 = tpu.matmul %80, %81, %cst_37 {dimension_numbers = #tpu.dot_dimension_numbers<[1], [0], [0], [1], [0, 0, 1, 1], [], []>} : vector<8x8xbf16>, vector<8x8xbf16>, vector<8x8xf32> -> vector<8x8xf32>
      %c0_38 = arith.constant 0 : index
      %c16 = arith.constant 16 : index
      %83 = vector.load %arg19[%c0_38, %c16] : memref<8x32xf32, #tpu.memory_space<vmem>>, vector<8x8xf32>
      tpu.vector_store %arg19[%c0_38, %c16], %82 {strides = array<i32>} : memref<8x32xf32, #tpu.memory_space<vmem>>, vector<8x8xf32>,
      %84 = vector.extract_strided_slice %32 {offsets = [0, 24], sizes = [8, 8], strides = [1, 1]} : vector<8x32xbf16> to vector<8x8xbf16>
      %85 = vector.extract_strided_slice %29 {offsets = [0, 24], sizes = [8, 8], strides = [1, 1]} : vector<8x32xbf16> to vector<8x8xbf16>
      %cst_39 = arith.constant dense<0.000000e+00> : vector<8x8xf32>
      %86 = tpu.matmul %84, %85, %cst_39 {dimension_numbers = #tpu.dot_dimension_numbers<[1], [1], [0], [0], [0, 0, 1, 0], [], []>} : vector<8x8xbf16>, vector<8x8xbf16>, vector<8x8xf32> -> vector<8x8xf32>
      %cst_40 = arith.constant dense<0xFF800000> : vector<8xf32>
      %87 = vector.multi_reduction <maximumf>, %86, %cst_40 [1] : vector<8x8xf32> to vector<8xf32>
      %88 = vector.shape_cast %87 : vector<8xf32> to vector<8x1xf32>
      %89 = vector.broadcast %88 : vector<8x1xf32> to vector<8x8xf32>
      %90 = arith.subf %86, %89 : vector<8x8xf32>
      %91 = math.exp %90 : vector<8x8xf32>
      %cst_41 = arith.constant dense<0.000000e+00> : vector<8xf32>
      %92 = vector.multi_reduction <add>, %91, %cst_41 [1] : vector<8x8xf32> to vector<8xf32>
      %93 = vector.shape_cast %92 : vector<8xf32> to vector<8x1xf32>
      %94 = tpu.reciprocal %93 {approx = true} : vector<8x1xf32> -> vector<8x1xf32>
      %95 = vector.broadcast %94 : vector<8x1xf32> to vector<8x8xf32>
      %96 = arith.mulf %91, %95 : vector<8x8xf32>
      %97 = arith.truncf %96 : vector<8x8xf32> to vector<8x8xbf16>
      %98 = vector.extract_strided_slice %31 {offsets = [0, 24], sizes = [8, 8], strides = [1, 1]} : vector<8x32xbf16> to vector<8x8xbf16>
      %cst_42 = arith.constant dense<0.000000e+00> : vector<8x8xf32>
      %99 = tpu.matmul %97, %98, %cst_42 {dimension_numbers = #tpu.dot_dimension_numbers<[1], [0], [0], [1], [0, 0, 1, 1], [], []>} : vector<8x8xbf16>, vector<8x8xbf16>, vector<8x8xf32> -> vector<8x8xf32>
      %c0_43 = arith.constant 0 : index
      %c24 = arith.constant 24 : index
      %100 = vector.load %arg19[%c0_43, %c24] : memref<8x32xf32, #tpu.memory_space<vmem>>, vector<8x8xf32>
      tpu.vector_store %arg19[%c0_43, %c24], %99 {strides = array<i32>} : memref<8x32xf32, #tpu.memory_space<vmem>>, vector<8x8xf32>,
      %c0_44 = arith.constant 0 : index
      %c0_45 = arith.constant 0 : index
      %101 = vector.load %arg19[%c0_44, %c0_45] : memref<8x32xf32, #tpu.memory_space<vmem>>, vector<8x32xf32>
      %102 = arith.truncf %101 : vector<8x32xf32> to vector<8x32xbf16>
      %c0_46 = arith.constant 0 : index
      %c0_47 = arith.constant 0 : index
      %103 = vector.load %arg5[%c0_46, %c0_47] : memref<32x32xbf16, #tpu.memory_space<vmem>>, vector<32x32xbf16>
      %cst_48 = arith.constant dense<0.000000e+00> : vector<8x32xf32>
      %104 = tpu.matmul %102, %103, %cst_48 {dimension_numbers = #tpu.dot_dimension_numbers<[1], [0], [0], [1], [0, 0, 1, 1], [], []>} : vector<8x32xbf16>, vector<32x32xbf16>, vector<8x32xf32> -> vector<8x32xf32>
      %c0_49 = arith.constant 0 : index
      %c0_50 = arith.constant 0 : index
      %105 = vector.load %arg6[%c0_49, %c0_50] : memref<1x32xf32, #tpu.memory_space<vmem>>, vector<1x32xf32>
      %106 = vector.broadcast %105 : vector<1x32xf32> to vector<8x32xf32>
      %107 = arith.addf %104, %106 : vector<8x32xf32>
      %c0_51 = arith.constant 0 : index
      %c0_52 = arith.constant 0 : index
      %108 = vector.load %arg7[%c0_51, %c0_52] : memref<32x32xbf16, #tpu.memory_space<vmem>>, vector<32x32xbf16>
      %cst_53 = arith.constant dense<0.000000e+00> : vector<8x32xf32>
      %109 = tpu.matmul %21, %108, %cst_53 {dimension_numbers = #tpu.dot_dimension_numbers<[1], [0], [0], [1], [0, 0, 1, 1], [], []>} : vector<8x32xbf16>, vector<32x32xbf16>, vector<8x32xf32> -> vector<8x32xf32>
      %c0_54 = arith.constant 0 : index
      %c0_55 = arith.constant 0 : index
      %110 = vector.load %arg8[%c0_54, %c0_55] : memref<1x32xf32, #tpu.memory_space<vmem>>, vector<1x32xf32>
      %111 = vector.broadcast %110 : vector<1x32xf32> to vector<8x32xf32>
      %112 = arith.addf %109, %111 : vector<8x32xf32>
      %113 = arith.truncf %112 : vector<8x32xf32> to vector<8x32xbf16>
      %114 = vector.extract_strided_slice %113 {offsets = [0, 0], sizes = [8, 8], strides = [1, 1]} : vector<8x32xbf16> to vector<8x8xbf16>
      %115 = vector.extract_strided_slice %9 {offsets = [0, 0], sizes = [8, 8], strides = [1, 1]} : vector<8x32xbf16> to vector<8x8xbf16>
      %cst_56 = arith.constant dense<0.000000e+00> : vector<8x8xf32>
      %116 = tpu.matmul %114, %115, %cst_56 {dimension_numbers = #tpu.dot_dimension_numbers<[1], [1], [0], [0], [0, 0, 1, 0], [], []>} : vector<8x8xbf16>, vector<8x8xbf16>, vector<8x8xf32> -> vector<8x8xf32>
      %cst_57 = arith.constant dense<0xFF800000> : vector<8xf32>
      %117 = vector.multi_reduction <maximumf>, %116, %cst_57 [1] : vector<8x8xf32> to vector<8xf32>
      %118 = vector.shape_cast %117 : vector<8xf32> to vector<8x1xf32>
      %119 = vector.broadcast %118 : vector<8x1xf32> to vector<8x8xf32>
      %120 = arith.subf %116, %119 : vector<8x8xf32>
      %121 = math.exp %120 : vector<8x8xf32>
      %cst_58 = arith.constant dense<0.000000e+00> : vector<8xf32>
      %122 = vector.multi_reduction <add>, %121, %cst_58 [1] : vector<8x8xf32> to vector<8xf32>
      %123 = vector.shape_cast %122 : vector<8xf32> to vector<8x1xf32>
      %124 = tpu.reciprocal %123 {approx = true} : vector<8x1xf32> -> vector<8x1xf32>
      %125 = vector.broadcast %124 : vector<8x1xf32> to vector<8x8xf32>
      %126 = arith.mulf %121, %125 : vector<8x8xf32>
      %127 = arith.truncf %126 : vector<8x8xf32> to vector<8x8xbf16>
      %128 = vector.extract_strided_slice %11 {offsets = [0, 0], sizes = [8, 8], strides = [1, 1]} : vector<8x32xbf16> to vector<8x8xbf16>
      %cst_59 = arith.constant dense<0.000000e+00> : vector<8x8xf32>
      %129 = tpu.matmul %127, %128, %cst_59 {dimension_numbers = #tpu.dot_dimension_numbers<[1], [0], [0], [1], [0, 0, 1, 1], [], []>} : vector<8x8xbf16>, vector<8x8xbf16>, vector<8x8xf32> -> vector<8x8xf32>
      %c0_60 = arith.constant 0 : index
      %c0_61 = arith.constant 0 : index
      %130 = vector.load %arg19[%c0_60, %c0_61] : memref<8x32xf32, #tpu.memory_space<vmem>>, vector<8x8xf32>
      tpu.vector_store %arg19[%c0_60, %c0_61], %129 {strides = array<i32>} : memref<8x32xf32, #tpu.memory_space<vmem>>, vector<8x8xf32>,
      %131 = vector.extract_strided_slice %113 {offsets = [0, 8], sizes = [8, 8], strides = [1, 1]} : vector<8x32xbf16> to vector<8x8xbf16>
      %132 = vector.extract_strided_slice %9 {offsets = [0, 8], sizes = [8, 8], strides = [1, 1]} : vector<8x32xbf16> to vector<8x8xbf16>
      %cst_62 = arith.constant dense<0.000000e+00> : vector<8x8xf32>
      %133 = tpu.matmul %131, %132, %cst_62 {dimension_numbers = #tpu.dot_dimension_numbers<[1], [1], [0], [0], [0, 0, 1, 0], [], []>} : vector<8x8xbf16>, vector<8x8xbf16>, vector<8x8xf32> -> vector<8x8xf32>
      %cst_63 = arith.constant dense<0xFF800000> : vector<8xf32>
      %134 = vector.multi_reduction <maximumf>, %133, %cst_63 [1] : vector<8x8xf32> to vector<8xf32>
      %135 = vector.shape_cast %134 : vector<8xf32> to vector<8x1xf32>
      %136 = vector.broadcast %135 : vector<8x1xf32> to vector<8x8xf32>
      %137 = arith.subf %133, %136 : vector<8x8xf32>
      %138 = math.exp %137 : vector<8x8xf32>
      %cst_64 = arith.constant dense<0.000000e+00> : vector<8xf32>
      %139 = vector.multi_reduction <add>, %138, %cst_64 [1] : vector<8x8xf32> to vector<8xf32>
      %140 = vector.shape_cast %139 : vector<8xf32> to vector<8x1xf32>
      %141 = tpu.reciprocal %140 {approx = true} : vector<8x1xf32> -> vector<8x1xf32>
      %142 = vector.broadcast %141 : vector<8x1xf32> to vector<8x8xf32>
      %143 = arith.mulf %138, %142 : vector<8x8xf32>
      %144 = arith.truncf %143 : vector<8x8xf32> to vector<8x8xbf16>
      %145 = vector.extract_strided_slice %11 {offsets = [0, 8], sizes = [8, 8], strides = [1, 1]} : vector<8x32xbf16> to vector<8x8xbf16>
      %cst_65 = arith.constant dense<0.000000e+00> : vector<8x8xf32>
      %146 = tpu.matmul %144, %145, %cst_65 {dimension_numbers = #tpu.dot_dimension_numbers<[1], [0], [0], [1], [0, 0, 1, 1], [], []>} : vector<8x8xbf16>, vector<8x8xbf16>, vector<8x8xf32> -> vector<8x8xf32>
      %c0_66 = arith.constant 0 : index
      %c8_67 = arith.constant 8 : index
      %147 = vector.load %arg19[%c0_66, %c8_67] : memref<8x32xf32, #tpu.memory_space<vmem>>, vector<8x8xf32>
      tpu.vector_store %arg19[%c0_66, %c8_67], %146 {strides = array<i32>} : memref<8x32xf32, #tpu.memory_space<vmem>>, vector<8x8xf32>,
      %148 = vector.extract_strided_slice %113 {offsets = [0, 16], sizes = [8, 8], strides = [1, 1]} : vector<8x32xbf16> to vector<8x8xbf16>
      %149 = vector.extract_strided_slice %9 {offsets = [0, 16], sizes = [8, 8], strides = [1, 1]} : vector<8x32xbf16> to vector<8x8xbf16>
      %cst_68 = arith.constant dense<0.000000e+00> : vector<8x8xf32>
      %150 = tpu.matmul %148, %149, %cst_68 {dimension_numbers = #tpu.dot_dimension_numbers<[1], [1], [0], [0], [0, 0, 1, 0], [], []>} : vector<8x8xbf16>, vector<8x8xbf16>, vector<8x8xf32> -> vector<8x8xf32>
      %cst_69 = arith.constant dense<0xFF800000> : vector<8xf32>
      %151 = vector.multi_reduction <maximumf>, %150, %cst_69 [1] : vector<8x8xf32> to vector<8xf32>
      %152 = vector.shape_cast %151 : vector<8xf32> to vector<8x1xf32>
      %153 = vector.broadcast %152 : vector<8x1xf32> to vector<8x8xf32>
      %154 = arith.subf %150, %153 : vector<8x8xf32>
      %155 = math.exp %154 : vector<8x8xf32>
      %cst_70 = arith.constant dense<0.000000e+00> : vector<8xf32>
      %156 = vector.multi_reduction <add>, %155, %cst_70 [1] : vector<8x8xf32> to vector<8xf32>
      %157 = vector.shape_cast %156 : vector<8xf32> to vector<8x1xf32>
      %158 = tpu.reciprocal %157 {approx = true} : vector<8x1xf32> -> vector<8x1xf32>
      %159 = vector.broadcast %158 : vector<8x1xf32> to vector<8x8xf32>
      %160 = arith.mulf %155, %159 : vector<8x8xf32>
      %161 = arith.truncf %160 : vector<8x8xf32> to vector<8x8xbf16>
      %162 = vector.extract_strided_slice %11 {offsets = [0, 16], sizes = [8, 8], strides = [1, 1]} : vector<8x32xbf16> to vector<8x8xbf16>
      %cst_71 = arith.constant dense<0.000000e+00> : vector<8x8xf32>
      %163 = tpu.matmul %161, %162, %cst_71 {dimension_numbers = #tpu.dot_dimension_numbers<[1], [0], [0], [1], [0, 0, 1, 1], [], []>} : vector<8x8xbf16>, vector<8x8xbf16>, vector<8x8xf32> -> vector<8x8xf32>
      %c0_72 = arith.constant 0 : index
      %c16_73 = arith.constant 16 : index
      %164 = vector.load %arg19[%c0_72, %c16_73] : memref<8x32xf32, #tpu.memory_space<vmem>>, vector<8x8xf32>
      tpu.vector_store %arg19[%c0_72, %c16_73], %163 {strides = array<i32>} : memref<8x32xf32, #tpu.memory_space<vmem>>, vector<8x8xf32>,
      %165 = vector.extract_strided_slice %113 {offsets = [0, 24], sizes = [8, 8], strides = [1, 1]} : vector<8x32xbf16> to vector<8x8xbf16>
      %166 = vector.extract_strided_slice %9 {offsets = [0, 24], sizes = [8, 8], strides = [1, 1]} : vector<8x32xbf16> to vector<8x8xbf16>
      %cst_74 = arith.constant dense<0.000000e+00> : vector<8x8xf32>
      %167 = tpu.matmul %165, %166, %cst_74 {dimension_numbers = #tpu.dot_dimension_numbers<[1], [1], [0], [0], [0, 0, 1, 0], [], []>} : vector<8x8xbf16>, vector<8x8xbf16>, vector<8x8xf32> -> vector<8x8xf32>
      %cst_75 = arith.constant dense<0xFF800000> : vector<8xf32>
      %168 = vector.multi_reduction <maximumf>, %167, %cst_75 [1] : vector<8x8xf32> to vector<8xf32>
      %169 = vector.shape_cast %168 : vector<8xf32> to vector<8x1xf32>
      %170 = vector.broadcast %169 : vector<8x1xf32> to vector<8x8xf32>
      %171 = arith.subf %167, %170 : vector<8x8xf32>
      %172 = math.exp %171 : vector<8x8xf32>
      %cst_76 = arith.constant dense<0.000000e+00> : vector<8xf32>
      %173 = vector.multi_reduction <add>, %172, %cst_76 [1] : vector<8x8xf32> to vector<8xf32>
      %174 = vector.shape_cast %173 : vector<8xf32> to vector<8x1xf32>
      %175 = tpu.reciprocal %174 {approx = true} : vector<8x1xf32> -> vector<8x1xf32>
      %176 = vector.broadcast %175 : vector<8x1xf32> to vector<8x8xf32>
      %177 = arith.mulf %172, %176 : vector<8x8xf32>
      %178 = arith.truncf %177 : vector<8x8xf32> to vector<8x8xbf16>
      %179 = vector.extract_strided_slice %11 {offsets = [0, 24], sizes = [8, 8], strides = [1, 1]} : vector<8x32xbf16> to vector<8x8xbf16>
      %cst_77 = arith.constant dense<0.000000e+00> : vector<8x8xf32>
      %180 = tpu.matmul %178, %179, %cst_77 {dimension_numbers = #tpu.dot_dimension_numbers<[1], [0], [0], [1], [0, 0, 1, 1], [], []>} : vector<8x8xbf16>, vector<8x8xbf16>, vector<8x8xf32> -> vector<8x8xf32>
      %c0_78 = arith.constant 0 : index
      %c24_79 = arith.constant 24 : index
      %181 = vector.load %arg19[%c0_78, %c24_79] : memref<8x32xf32, #tpu.memory_space<vmem>>, vector<8x8xf32>
      tpu.vector_store %arg19[%c0_78, %c24_79], %180 {strides = array<i32>} : memref<8x32xf32, #tpu.memory_space<vmem>>, vector<8x8xf32>,
      %c0_80 = arith.constant 0 : index
      %c0_81 = arith.constant 0 : index
      %182 = vector.load %arg19[%c0_80, %c0_81] : memref<8x32xf32, #tpu.memory_space<vmem>>, vector<8x32xf32>
      %183 = arith.truncf %182 : vector<8x32xf32> to vector<8x32xbf16>
      %c0_82 = arith.constant 0 : index
      %c0_83 = arith.constant 0 : index
      %184 = vector.load %arg11[%c0_82, %c0_83] : memref<32x32xbf16, #tpu.memory_space<vmem>>, vector<32x32xbf16>
      %cst_84 = arith.constant dense<0.000000e+00> : vector<8x32xf32>
      %185 = tpu.matmul %183, %184, %cst_84 {dimension_numbers = #tpu.dot_dimension_numbers<[1], [0], [0], [1], [0, 0, 1, 1], [], []>} : vector<8x32xbf16>, vector<32x32xbf16>, vector<8x32xf32> -> vector<8x32xf32>
      %c0_85 = arith.constant 0 : index
      %c0_86 = arith.constant 0 : index
      %186 = vector.load %arg12[%c0_85, %c0_86] : memref<1x32xf32, #tpu.memory_space<vmem>>, vector<1x32xf32>
      %187 = vector.broadcast %186 : vector<1x32xf32> to vector<8x32xf32>
      %188 = arith.addf %185, %187 : vector<8x32xf32>
      %cst_87 = arith.constant 5.000000e-01 : f32
      %189 = vector.broadcast %cst_87 : f32 to vector<8x32xf32>
      %190 = arith.mulf %189, %107 : vector<8x32xf32>
      %191 = arith.addf %20, %190 : vector<8x32xf32>
      %cst_88 = arith.constant 5.000000e-01 : f32
      %192 = vector.broadcast %cst_88 : f32 to vector<8x32xf32>
      %193 = arith.mulf %192, %188 : vector<8x32xf32>
      %194 = arith.addf %191, %193 : vector<8x32xf32>
      %195 = arith.truncf %194 : vector<8x32xf32> to vector<8x32xbf16>
      %c0_89 = arith.constant 0 : index
      %c0_90 = arith.constant 0 : index
      %196 = vector.load %arg13[%c0_89, %c0_90] : memref<32x64xbf16, #tpu.memory_space<vmem>>, vector<32x64xbf16>
      %cst_91 = arith.constant dense<0.000000e+00> : vector<8x64xf32>
      %197 = tpu.matmul %195, %196, %cst_91 {dimension_numbers = #tpu.dot_dimension_numbers<[1], [0], [0], [1], [0, 0, 1, 1], [], []>} : vector<8x32xbf16>, vector<32x64xbf16>, vector<8x64xf32> -> vector<8x64xf32>
      %c0_92 = arith.constant 0 : index
      %c0_93 = arith.constant 0 : index
      %198 = vector.load %arg14[%c0_92, %c0_93] : memref<1x64xf32, #tpu.memory_space<vmem>>, vector<1x64xf32>
      %199 = vector.broadcast %198 : vector<1x64xf32> to vector<8x64xf32>
      %200 = arith.addf %197, %199 : vector<8x64xf32>
      %cst_94 = arith.constant 0.000000e+00 : f32
      %201 = vector.broadcast %cst_94 : f32 to vector<8x64xf32>
      %202 = arith.maximumf %200, %201 : vector<8x64xf32>
      %203 = arith.truncf %202 : vector<8x64xf32> to vector<8x64xbf16>
      %c0_95 = arith.constant 0 : index
      %c0_96 = arith.constant 0 : index
      %204 = vector.load %arg15[%c0_95, %c0_96] : memref<64x32xbf16, #tpu.memory_space<vmem>>, vector<64x32xbf16>
      %cst_97 = arith.constant dense<0.000000e+00> : vector<8x32xf32>
      %205 = tpu.matmul %203, %204, %cst_97 {dimension_numbers = #tpu.dot_dimension_numbers<[1], [0], [0], [1], [0, 0, 1, 1], [], []>} : vector<8x64xbf16>, vector<64x32xbf16>, vector<8x32xf32> -> vector<8x32xf32>
      %c0_98 = arith.constant 0 : index
      %c0_99 = arith.constant 0 : index
      %206 = vector.load %arg16[%c0_98, %c0_99] : memref<1x32xf32, #tpu.memory_space<vmem>>, vector<1x32xf32>
      %207 = vector.broadcast %206 : vector<1x32xf32> to vector<8x32xf32>
      %208 = arith.addf %205, %207 : vector<8x32xf32>
      %209 = arith.addf %194, %208 : vector<8x32xf32>
      %c0_100 = arith.constant 0 : index
      %c0_101 = arith.constant 0 : index
      %210 = vector.load %arg18[%c0_100, %c0_101] : memref<8x32xf32, #tpu.memory_space<vmem>>, vector<8x32xf32>
      tpu.vector_store %arg18[%c0_100, %c0_101], %209 {strides = array<i32>} : memref<8x32xf32, #tpu.memory_space<vmem>>, vector<8x32xf32>,
    }
    %c0_11 = arith.constant 0 : index
    %c0_12 = arith.constant 0 : index
    %16 = vector.load %arg18[%c0_11, %c0_12] : memref<8x32xf32, #tpu.memory_space<vmem>>, vector<8x32xf32>
    %c0_13 = arith.constant 0 : index
    %c0_14 = arith.constant 0 : index
    %c0_15 = arith.constant 0 : index
    %17 = vector.load %arg17[%c0_13, %c0_14, %c0_15] : memref<1x8x32xf32, #tpu.memory_space<vmem>>, vector<1x8x32xf32>
    %18 = vector.shape_cast %17 : vector<1x8x32xf32> to vector<8x32xf32>
    %19 = vector.shape_cast %16 : vector<8x32xf32> to vector<1x8x32xf32>
    tpu.vector_store %arg17[%c0_13, %c0_14, %c0_15], %19 {strides = array<i32>} : memref<1x8x32xf32, #tpu.memory_space<vmem>>, vector<1x8x32xf32>,
    return
  }
  func.func @transform_0(%arg0: i32) -> (i32, i32, i32) {
    %c0_i32 = arith.constant 0 : i32
    %c0_i32_0 = arith.constant 0 : i32
    %c0_i32_1 = arith.constant 0 : i32
    return %arg0, %c0_i32, %c0_i32_0 : i32, i32, i32
  }
  func.func @transform_1(%arg0: i32) -> (i32, i32, i32) {
    %c0_i32 = arith.constant 0 : i32
    %c0_i32_0 = arith.constant 0 : i32
    %c0_i32_1 = arith.constant 0 : i32
    return %arg0, %c0_i32, %c0_i32_0 : i32, i32, i32
  }
  func.func @transform_2(%arg0: i32) -> (i32, i32) {
    %c0_i32 = arith.constant 0 : i32
    %c0_i32_0 = arith.constant 0 : i32
    %c0_i32_1 = arith.constant 0 : i32
    return %c0_i32, %c0_i32_0 : i32, i32
  }
  func.func @transform_3(%arg0: i32) -> (i32, i32) {
    %c0_i32 = arith.constant 0 : i32
    %c0_i32_0 = arith.constant 0 : i32
    %c0_i32_1 = arith.constant 0 : i32
    return %c0_i32, %c0_i32_0 : i32, i32
  }
  func.func @transform_4(%arg0: i32) -> (i32, i32) {
    %c0_i32 = arith.constant 0 : i32
    %c0_i32_0 = arith.constant 0 : i32
    %c0_i32_1 = arith.constant 0 : i32
    return %c0_i32, %c0_i32_0 : i32, i32
  }
  func.func @transform_5(%arg0: i32) -> (i32, i32) {
    %c0_i32 = arith.constant 0 : i32
    %c0_i32_0 = arith.constant 0 : i32
    %c0_i32_1 = arith.constant 0 : i32
    return %c0_i32, %c0_i32_0 : i32, i32
  }
  func.func @transform_6(%arg0: i32) -> (i32, i32) {
    %c0_i32 = arith.constant 0 : i32
    %c0_i32_0 = arith.constant 0 : i32
    %c0_i32_1 = arith.constant 0 : i32
    return %c0_i32, %c0_i32_0 : i32, i32
  }
  func.func @transform_7(%arg0: i32) -> (i32, i32) {
    %c0_i32 = arith.constant 0 : i32
    %c0_i32_0 = arith.constant 0 : i32
    %c0_i32_1 = arith.constant 0 : i32
    return %c0_i32, %c0_i32_0 : i32, i32
  }
  func.func @transform_8(%arg0: i32) -> (i32, i32) {
    %c0_i32 = arith.constant 0 : i32
    %c0_i32_0 = arith.constant 0 : i32
    %c0_i32_1 = arith.constant 0 : i32
    return %c0_i32, %c0_i32_0 : i32, i32
  }
  func.func @transform_9(%arg0: i32) -> (i32, i32) {
    %c0_i32 = arith.constant 0 : i32
    %c0_i32_0 = arith.constant 0 : i32
    %c0_i32_1 = arith.constant 0 : i32
    return %c0_i32, %c0_i32_0 : i32, i32
  }
  func.func @transform_10(%arg0: i32) -> (i32, i32) {
    %c0_i32 = arith.constant 0 : i32
    %c0_i32_0 = arith.constant 0 : i32
    %c0_i32_1 = arith.constant 0 : i32
    return %c0_i32, %c0_i32_0 : i32, i32
  }
  func.func @transform_11(%arg0: i32) -> (i32, i32) {
    %c0_i32 = arith.constant 0 : i32
    %c0_i32_0 = arith.constant 0 : i32
    %c0_i32_1 = arith.constant 0 : i32
    return %c0_i32, %c0_i32_0 : i32, i32
  }
  func.func @transform_12(%arg0: i32) -> (i32, i32) {
    %c0_i32 = arith.constant 0 : i32
    %c0_i32_0 = arith.constant 0 : i32
    %c0_i32_1 = arith.constant 0 : i32
    return %c0_i32, %c0_i32_0 : i32, i32
  }
  func.func @transform_13(%arg0: i32) -> (i32, i32) {
    %c0_i32 = arith.constant 0 : i32
    %c0_i32_0 = arith.constant 0 : i32
    %c0_i32_1 = arith.constant 0 : i32
    return %c0_i32, %c0_i32_0 : i32, i32
  }
  func.func @transform_14(%arg0: i32) -> (i32, i32) {
    %c0_i32 = arith.constant 0 : i32
    %c0_i32_0 = arith.constant 0 : i32
    %c0_i32_1 = arith.constant 0 : i32
    return %c0_i32, %c0_i32_0 : i32, i32
  }
  func.func @transform_15(%arg0: i32) -> (i32, i32) {
    %c0_i32 = arith.constant 0 : i32
    %c0_i32_0 = arith.constant 0 : i32
    %c0_i32_1 = arith.constant 0 : i32
    return %c0_i32, %c0_i32_0 : i32, i32
  }
  func.func @transform_16(%arg0: i32) -> (i32, i32, i32) {
    %c0_i32 = arith.constant 0 : i32
    %c0_i32_0 = arith.constant 0 : i32
    %c0_i32_1 = arith.constant 0 : i32
    return %arg0, %c0_i32, %c0_i32_0 : i32, i32, i32
  }
}

</mosaic_0001>

<bundles_post_ra>
// kernel: _lambda_.1
= control target key start
LH: loop header
LB: loop body
LE: loop exit
PB: predicated region body
PF: predicated region fallthrough
CT: control target
= control target key end

     0   :  { %s2508_s21 = smov 0   ;;  %s2815_s0 = inlined_call_operand.vmem [shape: f32[2,8,32], index: 0, kind: input, shape index: {}]   ;;  %s2816_s1 = inlined_call_operand.vmem [shape: f32[2,8,48], index: 1, kind: input, shape index: {}]   ;;  %s2817_s2 = inlined_call_operand.vmem [shape: bf16[32,96], index: 2, kind: input, shape index: {}]   ;;  %s2818_s3 = inlined_call_operand.vmem [shape: f32[1,96], index: 3, kind: input, shape index: {}]   ;;  %s2819_s4 = inlined_call_operand.vmem [shape: bf16[32,32], index: 4, kind: input, shape index: {}]   ;;  %s2820_s5 = inlined_call_operand.vmem [shape: f32[1,32], index: 5, kind: input, shape index: {}]   ;;  %s2821_s6 = inlined_call_operand.vmem [shape: bf16[32,32], index: 6, kind: input, shape index: {}]   ;;  %s2822_s7 = inlined_call_operand.vmem [shape: f32[1,32], index: 7, kind: input, shape index: {}]   ;;  %s2823_s8 = inlined_call_operand.vmem [shape: bf16[48,64], index: 8, kind: input, shape index: {}]   ;;  %s2824_s9 = inlined_call_operand.vmem [shape: f32[1,64], index: 9, kind: input, shape index: {}]   ;;  %s2825_s10 = inlined_call_operand.vmem [shape: bf16[32,32], index: 10, kind: input, shape index: {}]   ;;  %s2826_s11 = inlined_call_operand.vmem [shape: f32[1,32], index: 11, kind: input, shape index: {}]   ;;  %s2827_s12 = inlined_call_operand.vmem [shape: bf16[32,64], index: 12, kind: input, shape index: {}]   ;;  %s2828_s13 = inlined_call_operand.vmem [shape: f32[1,64], index: 13, kind: input, shape index: {}]   ;;  %s2829_s14 = inlined_call_operand.vmem [shape: bf16[64,32], index: 14, kind: input, shape index: {}]   ;;  %s2830_s15 = inlined_call_operand.vmem [shape: f32[1,32], index: 15, kind: input, shape index: {}]   ;;  %s2831_s16 = inlined_call_operand.vmem [shape: f32[2,8,32], index: 16, kind: output, shape index: {}]  }
   0x1   :  { %2833 = sst [smem:[#allocation4_spill]] %s2815_s0 }
   0x2 LB: > { %s2035_s22 = sadd.s32 4294967295, %s2399_s21   ;;  %p2039_p0 = scmp.ge.s32.totalorder %s2399_s21, 1  ;;  %s2399_s21 = sphi %s2508_s21, %s26_s21  }
   0x3   : > { %p470_p1 = scmp.lt.s32.totalorder %s2399_s21, 3 }
   0x5   : > { %p471_p2 = pnand %p2039_p0, %p470_p1 }
   0x6   : > { %v2340_v0 = vld [vmem:[%s2823_s8] sm:$0xff] (!%p471_p2)   ;;  %v2405_v1 = vmov (!%p471_p2), 0.0   ;;  %v2341_v2 = vld [vmem:[%s2823_s8 + $0x8] sm:$0xff] (!%p471_p2)   ;;  %vm2406_vm0 = vmmov (!%p471_p2), 0   ;;  %p522_p3 = scmp.lt.s32.totalorder (!%p471_p2), %s2035_s22, 1  ;;  %v2342_v3 = vld [vmem:[%s2823_s8 + $0x10] sm:$0xff] (!%p471_p2)  }
   0x7   : > { %474 = sbr.rel (%p471_p2) target bundleno = 3107 (0xc23), region = 84  ;;  %2148 = vmatprep.subr.bf16.mxu0 (!%p471_p2), %v2405_v1  ;;  %2154 = vmatprep.mubr.msk.bf16.mxu0 (!%p471_p2), %vm2406_vm0, %v2405_v1  ;;  %vm614_vm1 = vcmask (!%p471_p2), 261120   ;;  %s2834_s17 = sld [smem:[#allocation4_spill]] (!%p471_p2)  ;;  %vm568_vm2 = vcmask (!%p471_p2), 392192   ;;  %v2043_v7 = vld [vmem:[%s2824_s9] ss:$0 sm:$0xff] (!%p471_p2) }
   0x8   : > { %2149 = vmatpush3.bf16.msra.mxu0 (!%p471_p2), %v2340_v0  ;;  %s2545_s28 = smov (!%p471_p2), 0  }
   0x9   : > { %2150 = vmatprep.subr.bf16.mxu0 (!%p471_p2), %v2405_v1 }
   0xc   : > { %2151 = vmatpush3.bf16.msra.mxu0 (!%p471_p2), %v2341_v2 }
   0xd   : > { %2152 = vmatprep.subr.bf16.mxu0 (!%p471_p2), %v2405_v1 }
   0xe   : > { %s2838_s22 = smov (!%p522_p3, %s2035_s22), 1 }
   0xf   : > { %s2525_s29 = sshll.u32 %s2838_s22, 3 }
  0x10   : > { %s525_s18 = scalar_lea.vmem %s2834_s17, %s2525_s29  ;;  %s529_s23 = scalar_lea.vmem %s2816_s1, %s2525_s29  ;;  %2153 = vmatpush3.bf16.msra.mxu0 %v2342_v3 }
  0x11   : > { %v535_v4 = vld [vmem:[%s529_s23] sm:$0xff] }
  0x12   : > { %v613_v5 = vld [vmem:[%s525_s18] sm:$0xff]  ;;  %v536_v6 = vpack.c.bf16 %v535_v4, %v535_v4 }
  0x13   : > { %615 = vst.msk [vmem:[#allocation2] sm:$0xff] %vm614_vm1, %v613_v5 }
  0x14   : > { %2155 = vmatmul.mubr.msk.bf16.vlgmr.msra.gmra.mrb[0].mxu0 %vm568_vm2, %v536_v6 }
  0xe7   : > { %v606_v8 = vpop.f32.mrb[0].mxu0 }
  0xe8   : > { %v607_v9 = vadd.f32 %v2043_v7, %v606_v8  ;;  %v2156_v10 = vpop.f32.mrb[1].mxu0 }
  0xe9   : > { %v609_v11 = vpop.f32.mrb[2].mxu0 }
  0xea   : > { %v2543_v12 = vpack.c.bf16 %v607_v9, %v607_v9  ;;  %v2157_v13 = vpop.f32.mrb[3].mxu0 }
  0xeb LB: >> { %v2343_v14 = vld [vmem:[%s2817_s2] sm:$0xff]   ;;  %v2407_v15 = vmov 0.0   ;;  %v2344_v16 = vld [vmem:[%s2817_s2 + $0x8] sm:$0xff]   ;;  %vm2408_vm3 = vmmov 0   ;;  %s2409_s23 = smov 120   ;;  %s2410_s24 = smov 96   ;;  %s2403_s28 = sphi %s2545_s28, %s621_s28  }
  0xec   : >> { %2158 = vmatprep.subr.bf16.mxu0 %v2407_v15  ;;  %2166 = vmatprep.subr.bf16.mxu1 %v2407_v15  ;;  %v2560_v17 = vld [vmem:[#allocation2] sm:$0xff]  ;;  %s2411_s25 = smov 80   ;;  %s2412_s22 = smov 88   ;;  %vm694_vm4 = vcmask 64512   ;;  %vm758_vm5 = vcmask 1043456   ;;  %vm917_vm6 = vcmask 130112  }
  0xed   : >> { %2159 = vmatpush3.bf16.msra.mxu0 %v2343_v14  ;;  %2162 = vmatprep.mubr.msk.bf16.mxu0 %vm2408_vm3, %v2407_v15  ;;  %v2567_v18 = vpack.c.bf16 %v2560_v17, %v2560_v17  ;;  %v2048_v19 = vld [vmem:[%s2818_s3] ss:$0 sm:$0xff]  ;;  %s2832_s27 = smov 72   ;;  %s2414_s30 = smov 112   ;;  %vm1033_vm7 = vcmask 195712   ;;  %vm1149_vm8 = vcmask 261312  }
  0xee   : >> { %2160 = vmatprep.subr.bf16.mxu0 %v2407_v15  ;;  %2168 = vmatprep.mubr.msk.bf16.mxu1 %vm2408_vm3, %v2407_v15  ;;  %s2415_s0 = smov 104   ;;  %s2416_s17 = smov 56   ;;  %vm1917_vm9 = vcmask 523264  }
  0xef   : >> { %s2417_s18 = smov 64   ;;  %s2418_s19 = smov 40  }
  0xf0   : >> { %s2419_s20 = smov 48   ;;  %s621_s28 = sadd.s32 1, %s2403_s28  }
  0xf1   : >> { %2161 = vmatpush3.bf16.msra.mxu0 %v2344_v16  ;;  %p618_p4 = scmp.ge.s32.totalorder %s621_s28, 6  }
  0xf2   : >> { %2172 = vmatprep.subr.bf16.mxu0 %v2407_v15 }
  0xf4   : >> { %2163 = vmatmul.mubr.msk.bf16.vlgmr.msra.gmra.mrb[0].mxu0 %vm614_vm1, %v2567_v18 }
  0xf5   : >> { %2174 = vmatprep.mubr.msk.bf16.mxu0 %vm2408_vm3, %v2407_v15 }
 0x1c7   : >> { %v684_v20 = vpop.f32.mrb[0].mxu0 }
 0x1c8   : >> { %v685_v21 = vadd.f32 %v2048_v19, %v684_v20  ;;  %v2164_v22 = vpop.f32.mrb[1].mxu0 }
 0x1c9   : >> { %v687_v23 = vpop.f32.mrb[2].mxu0 }
 0x1ca   : >> { %v2577_v24 = vpack.c.bf16 %v685_v21, %v685_v21  ;;  %v2165_v25 = vpop.f32.mrb[3].mxu0 }
 0x1cc   : >> { %803 = vrot.lane.b32.xlu1 %v2577_v24, %s2409_s23  ;;  %692 = vrot.lane.b32.xlu0 %v2577_v24, %s2410_s24 }
 0x1d0   : >> { %921 = vrot.lane.b32.xlu1 %v2577_v24, %s2411_s25  ;;  %805 = vrot.lane.b32.xlu0 %v2577_v24, %s2412_s22 }
 0x1d4   : >> { %1037 = vrot.lane.b32.xlu1 %v2577_v24, %s2832_s27  ;;  %919 = vrot.lane.b32.xlu0 %v2577_v24, %s2414_s30  ;;  %s2421_s27 = smov 16  }
 0x1d8   : >> { %1035 = vrot.lane.b32.xlu0 %v2577_v24, %s2415_s0 }
 0x23e   : >> { %v693_v26 = vpop.permute.xlu0 %692  ;;  %v804_v29 = vpop.permute.xlu1 %803 }
 0x23f   : >> { %v699_v27 = vsel %vm694_vm4, %v693_v26, 0 }
 0x240   : >> { %2167 = vmatpush3.bf16.xpose.msra.mxu1 %v699_v27 }
 0x241   : >> { %2178 = vmatprep.subr.bf16.mxu1 %v2407_v15 }
 0x242   : >> { %v806_v28 = vpop.permute.xlu0 %805  ;;  %v922_v31 = vpop.permute.xlu1 %921 }
 0x243   : >> { %v811_v30 = vsel %vm694_vm4, %v806_v28, 0  ;;  %v927_v32 = vsel %vm694_vm4, %v922_v31, 0 }
 0x246   : >> { %v1038_v33 = vpop.permute.xlu1 %1037  ;;  %v920_v34 = vpop.permute.xlu0 %919 }
 0x247   : >> { %2169 = vmatmul.mubr.msk.bf16.vlgmr.msra.gmra.mrb[0].mxu1 %vm694_vm4, %v2577_v24  ;;  %v1043_v35 = vsel %vm694_vm4, %v1038_v33, 0 }
 0x248   : >> { %2179 = vmatpush3.bf16.xpose.msra.mxu1 %v811_v30  ;;  %2180 = vmatprep.mubr.msk.bf16.mxu1 %vm2408_vm3, %v2407_v15 }
 0x249   : >> { %2190 = vmatprep.subr.bf16.mxu1 %v2407_v15 }
 0x24a   : >> { %v1036_v36 = vpop.permute.xlu0 %1035 }
 0x24f   : >> { %2181 = vmatmul.mubr.msk.bf16.vlgmr.msra.gmra.mrb[4].mxu1 %vm694_vm4, %v804_v29 }
 0x250   : >> { %2191 = vmatpush3.bf16.xpose.msra.mxu1 %v927_v32  ;;  %2192 = vmatprep.mubr.msk.bf16.mxu1 %vm2408_vm3, %v2407_v15 }
 0x251   : >> { %2202 = vmatprep.subr.bf16.mxu1 %v2407_v15 }
 0x257   : >> { %2193 = vmatmul.mubr.msk.bf16.vlgmr.msra.gmra.mrb[8].mxu1 %vm694_vm4, %v920_v34 }
 0x258   : >> { %2203 = vmatpush3.bf16.xpose.msra.mxu1 %v1043_v35  ;;  %2204 = vmatprep.mubr.msk.bf16.mxu1 %vm2408_vm3, %v2407_v15 }
 0x259   : >> { %2214 = vmatprep.subr.bf16.mxu1 %v2407_v15 }
 0x25f   : >> { %2205 = vmatmul.mubr.msk.bf16.vlgmr.msra.gmra.mrb[12].mxu1 %vm694_vm4, %v1036_v36 }
 0x260   : >> { %2218 = vmatprep.mubr.msk.bf16.mxu1 %vm2408_vm3, %v2407_v15 }
 0x31a   : >> { %v735_v37 = vpop.f32.mrb[0].mxu1 }
 0x31b   : >> { %v2170_v38 = vpop.f32.mrb[1].mxu1  ;;  %v741_v39 = vsel %vm694_vm4, %v735_v37, -inf }
 0x31c   : >> { %742 = vmax.xlane.f32.xlu1 %v741_v39  ;;  %v738_v40 = vpop.f32.mrb[2].mxu1 }
 0x31d   : >> { %v2171_v41 = vpop.f32.mrb[3].mxu1 }
 0x31e   : >> { %v2345_v41 = vld [vmem:[%s2821_s6] sm:$0xff]  }
 0x322   : >> { %v847_v42 = vpop.f32.mrb[4].mxu1 }
 0x323   : >> { %v2182_v43 = vpop.f32.mrb[5].mxu1  ;;  %v853_v44 = vsel %vm694_vm4, %v847_v42, -inf }
 0x324   : >> { %854 = vmax.xlane.f32.xlu0 %v853_v44  ;;  %v850_v45 = vpop.f32.mrb[6].mxu1 }
 0x325   : >> { %v2183_v46 = vpop.f32.mrb[7].mxu1 }
 0x32a   : >> { %v963_v47 = vpop.f32.mrb[8].mxu1 }
 0x32b   : >> { %v2194_v48 = vpop.f32.mrb[9].mxu1  ;;  %v969_v49 = vsel %vm694_vm4, %v963_v47, -inf }
 0x32c   : >> { %970 = vmax.xlane.f32.xlu0 %v969_v49  ;;  %v966_v50 = vpop.f32.mrb[10].mxu1 }
 0x32d   : >> { %v2195_v51 = vpop.f32.mrb[11].mxu1 }
 0x32e   : >> { %v2348_v51 = vld [vmem:[%s2819_s4 + $0x8] sm:$0xff]  }
 0x332   : >> { %v1079_v52 = vpop.f32.mrb[12].mxu1 }
 0x333   : >> { %v2206_v53 = vpop.f32.mrb[13].mxu1  ;;  %v1085_v54 = vsel %vm694_vm4, %v1079_v52, -inf }
 0x334   : >> { %1086 = vmax.xlane.f32.xlu1 %v1085_v54  ;;  %v1082_v55 = vpop.f32.mrb[14].mxu1 }
 0x335   : >> { %v2207_v56 = vpop.f32.mrb[15].mxu1 }
 0x3a9   : >> { %v743_v57 = vpop.xlane.xlu1 %742 }
 0x3aa   : >> { %v744_v58 = vsub.f32 %v735_v37, %v743_v57 }
 0x3ac   : >> { %v745_v59 = vmul.f32 1.442695, %v744_v58 }
 0x3ae   : >> { %2357 = vpow2.f32 %v745_v59 }
 0x3b1   : >> { %v855_v60 = vpop.xlane.xlu0 %854 }
 0x3b2   : >> { %v856_v61 = vsub.f32 %v847_v42, %v855_v60  ;;  %v2346_v42 = vld [vmem:[%s2821_s6 + $0x8] sm:$0xff]   ;;  %v2064_v60 = vld [vmem:[%s2822_s7] ss:$0 sm:$0xff] }
 0x3b4   : >> { %v857_v62 = vmul.f32 1.442695, %v856_v61 }
 0x3b6   : >> { %2359 = vpow2.f32 %v857_v62 }
 0x3b8   : >> { %v2358_v63 = vpop.eup %2357 }
 0x3b9   : >> { %v971_v0 = vpop.xlane.xlu0 %970  ;;  %v747_v1 = vsel %vm694_vm4, %v2358_v63, 0.0 }
 0x3ba   : >> { %v972_v2 = vsub.f32 %v963_v47, %v971_v0  ;;  %748 = vadd.xlane.f32.xlu0 %v747_v1 }
 0x3bc   : >> { %v973_v3 = vmul.f32 1.442695, %v972_v2 }
 0x3be   : >> { %2361 = vpow2.f32 %v973_v3 }
 0x3c0   : >> { %v2360_v4 = vpop.eup %2359 }
 0x3c1   : >> { %v859_v5 = vsel %vm694_vm4, %v2360_v4, 0.0  ;;  %v1087_v8 = vpop.xlane.xlu1 %1086 }
 0x3c2   : >> { %860 = vadd.xlane.f32.xlu1 %v859_v5  ;;  %v1088_v9 = vsub.f32 %v1079_v52, %v1087_v8  ;;  %v1287_v8 = vsel %vm694_vm4, %v2543_v12, 0 }
 0x3c4   : >> { %v1089_v10 = vmul.f32 1.442695, %v1088_v9 }
 0x3c6   : >> { %2363 = vpow2.f32 %v1089_v10 }
 0x3c8   : >> { %v2362_v6 = vpop.eup %2361 }
 0x3c9   : >> { %v975_v7 = vsel %vm694_vm4, %v2362_v6, 0.0 }
 0x3ca   : >> { %976 = vadd.xlane.f32.xlu0 %v975_v7 }
 0x3d0   : >> { %v2364_v11 = vpop.eup %2363 }
 0x3d1   : >> { %v1091_v13 = vsel %vm694_vm4, %v2364_v11, 0.0 }
 0x3d3   : >> { %865 = vrot.lane.b32.xlu1 %v2577_v24, %s2416_s17  ;;  %s2420_s17 = smov 8  }
 0x3e0   : >> { %753 = vrot.lane.b32.xlu0 %v2577_v24, %s2417_s18  ;;  %s2422_s18 = smov 24  }
 0x3e4   : >> { %1097 = vrot.lane.b32.xlu0 %v2577_v24, %s2418_s19 }
 0x3f7   : >> { %1092 = vadd.xlane.f32.xlu1 %v1091_v13 }
 0x408   : >> { %981 = vrot.lane.b32.xlu1 %v2577_v24, %s2419_s20 }
 0x447   : >> { %v749_v14 = vpop.xlane.xlu0 %748 }
 0x448   : >> { %2365 = vrcp.f32 %v749_v14 }
 0x44f   : >> { %v861_v16 = vpop.xlane.xlu1 %860 }
 0x450   : >> { %2367 = vrcp.f32 %v861_v16 }
 0x452   : >> { %v2366_v19 = vpop.eup %2365 }
 0x453   : >> { %v751_v21 = vmul.f32 %v2366_v19, %v2358_v63  ;;  %v866_v25 = vpop.permute.xlu1 %865 }
 0x454   : >> { %v871_v28 = vsel %vm758_vm5, %v866_v25, 0 }
 0x455   : >> { %v752_v26 = vpack.c.bf16 %v751_v21, %v751_v21 }
 0x457   : >> { %v977_v20 = vpop.xlane.xlu0 %976 }
 0x458   : >> { %2369 = vrcp.f32 %v977_v20 }
 0x45a   : >> { %v2368_v27 = vpop.eup %2367 }
 0x45b   : >> { %v754_v22 = vpop.permute.xlu0 %753  ;;  %v863_v24 = vmul.f32 %v2368_v27, %v2360_v4 }
 0x45c   : >> { %v760_v23 = vsel %vm758_vm5, %v754_v22, 0 }
 0x45d   : >> { %2173 = vmatpush3.bf16.msra.mxu0 %v760_v23  ;;  %v864_v29 = vpack.c.bf16 %v863_v24, %v863_v24 }
 0x45e   : >> { %2184 = vmatprep.subr.bf16.mxu0 %v2407_v15 }
 0x45f   : >> { %v1098_v35 = vpop.permute.xlu0 %1097 }
 0x460   : >> { %2175 = vmatmul.mubr.msk.bf16.vlgmr.msra.gmra.mrb[4].mxu0 %vm694_vm4, %v752_v26  ;;  %v1103_v37 = vsel %vm758_vm5, %v1098_v35, 0 }
 0x461   : >> { %2185 = vmatpush3.bf16.msra.mxu0 %v871_v28  ;;  %2186 = vmatprep.mubr.msk.bf16.mxu0 %vm2408_vm3, %v2407_v15 }
 0x462   : >> { %2196 = vmatprep.subr.bf16.mxu0 %v2407_v15  ;;  %v2370_v30 = vpop.eup %2369 }
 0x463   : >> { %v979_v32 = vmul.f32 %v2370_v30, %v2362_v6 }
 0x465   : >> { %v980_v36 = vpack.c.bf16 %v979_v32, %v979_v32 }
 0x468   : >> { %2187 = vmatmul.mubr.msk.bf16.vlgmr.msra.gmra.mrb[8].mxu0 %vm694_vm4, %v864_v29 }
 0x469   : >> { %2198 = vmatprep.mubr.msk.bf16.mxu0 %vm2408_vm3, %v2407_v15 }
 0x484   : >> { %v1093_v31 = vpop.xlane.xlu1 %1092 }
 0x485   : >> { %2371 = vrcp.f32 %v1093_v31 }
 0x488   : >> { %v982_v33 = vpop.permute.xlu1 %981 }
 0x489   : >> { %v987_v34 = vsel %vm758_vm5, %v982_v33, 0 }
 0x48a   : >> { %2197 = vmatpush3.bf16.msra.mxu0 %v987_v34 }
 0x48b   : >> { %2208 = vmatprep.subr.bf16.mxu0 %v2407_v15 }
 0x48d   : >> { %2199 = vmatmul.mubr.msk.bf16.vlgmr.msra.gmra.mrb[12].mxu0 %vm694_vm4, %v980_v36 }
 0x48e   : >> { %2209 = vmatpush3.bf16.msra.mxu0 %v1103_v37  ;;  %2210 = vmatprep.mubr.msk.bf16.mxu0 %vm2408_vm3, %v2407_v15 }
 0x48f   : >> { %v2372_v38 = vpop.eup %2371  ;;  %2222 = vmatprep.subr.bf16.mxu0 %v2407_v15 }
 0x490   : >> { %v1095_v39 = vmul.f32 %v2372_v38, %v2364_v11 }
 0x492   : >> { %v1096_v40 = vpack.c.bf16 %v1095_v39, %v1095_v39 }
 0x495   : >> { %2211 = vmatmul.mubr.msk.bf16.vlgmr.msra.gmra.mrb[16].mxu0 %vm694_vm4, %v1096_v40 }
 0x496   : >> { %2223 = vmatpush3.bf16.msra.mxu0 %v2345_v41  ;;  %2226 = vmatprep.mubr.msk.bf16.mxu0 %vm2408_vm3, %v2407_v15 }
 0x497   : >> { %2224 = vmatprep.subr.bf16.mxu0 %v2407_v15 }
 0x49a   : >> { %2225 = vmatpush3.bf16.msra.mxu0 %v2346_v42 }
 0x49b   : >> { %2236 = vmatprep.subr.bf16.mxu0 %v2407_v15 }
 0x49d   : >> { %2227 = vmatmul.mubr.msk.bf16.vlgmr.msra.gmra.mrb[20].mxu0 %vm614_vm1, %v2567_v18  ;;  %v2347_v18 = vld [vmem:[%s2819_s4] sm:$0xff]  }
 0x49e   : >> { %2238 = vmatprep.mubr.msk.bf16.mxu0 %vm2408_vm3, %v2407_v15  ;;  %2215 = vmatpush3.bf16.msra.mxu1 %v2347_v18 }
 0x49f   : >> { %2216 = vmatprep.subr.bf16.mxu1 %v2407_v15 }
 0x4a2   : >> { %2217 = vmatpush3.bf16.msra.mxu1 %v2348_v51 }
 0x4a3   : >> { %2230 = vmatprep.subr.bf16.mxu1 %v2407_v15 }
 0x533   : >> { %v796_v43 = vpop.f32.mrb[4].mxu0 }
 0x534   : >> { %802 = vst.msk [vmem:[#allocation3] sm:$0xff] %vm694_vm4, %v796_v43  ;;  %v2176_v44 = vpop.f32.mrb[5].mxu0 }
 0x535   : >> { %v799_v45 = vpop.f32.mrb[6].mxu0 }
 0x536   : >> { %v2177_v46 = vpop.f32.mrb[7].mxu0 }
 0x53b   : >> { %v907_v47 = vpop.f32.mrb[8].mxu0 }
 0x53c   : >> { %914 = vrot.lane.b32.xlu1 %v907_v47, %s2420_s17  ;;  %v2188_v48 = vpop.f32.mrb[9].mxu0 }
 0x53d   : >> { %v910_v49 = vpop.f32.mrb[10].mxu0 }
 0x53e   : >> { %v2189_v50 = vpop.f32.mrb[11].mxu0 }
 0x560   : >> { %v1023_v52 = vpop.f32.mrb[12].mxu0 }
 0x561   : >> { %1030 = vrot.lane.b32.xlu0 %v1023_v52, %s2421_s27  ;;  %v2200_v53 = vpop.f32.mrb[13].mxu0 }
 0x562   : >> { %v1026_v54 = vpop.f32.mrb[14].mxu0 }
 0x563   : >> { %v2201_v55 = vpop.f32.mrb[15].mxu0 }
 0x565   : >> { %1394 = vrot.lane.b32.xlu0 %v2543_v12, %s2409_s23 }
 0x568   : >> { %v1139_v56 = vpop.f32.mrb[16].mxu0 }
 0x569   : >> { %1146 = vrot.lane.b32.xlu1 %v1139_v56, %s2422_s18  ;;  %v2212_v57 = vpop.f32.mrb[17].mxu0  ;;  %1509 = vrot.lane.b32.xlu0 %v2543_v12, %s2414_s30 }
 0x56a   : >> { %v1142_v58 = vpop.f32.mrb[18].mxu0 }
 0x56b   : >> { %v2213_v59 = vpop.f32.mrb[19].mxu0 }
 0x56d   : >> { %1624 = vrot.lane.b32.xlu0 %v2543_v12, %s2415_s0 }
 0x570   : >> { %v1276_v61 = vpop.f32.mrb[20].mxu0 }
 0x571   : >> { %v1277_v62 = vadd.f32 %v2064_v60, %v1276_v61  ;;  %v2228_v63 = vpop.f32.mrb[21].mxu0 }
 0x572   : >> { %v1279_v0 = vpop.f32.mrb[22].mxu0 }
 0x573   : >> { %v1282_v1 = vpack.c.bf16 %v1277_v62, %v1277_v62  ;;  %v2229_v2 = vpop.f32.mrb[23].mxu0 }
 0x575   : >> { %1392 = vrot.lane.b32.xlu1 %v1282_v1, %s2409_s23  ;;  %s2835_s23 = smov 72  }
 0x579   : >> { %1507 = vrot.lane.b32.xlu1 %v1282_v1, %s2414_s30 }
 0x57d   : >> { %1622 = vrot.lane.b32.xlu1 %v1282_v1, %s2415_s0 }
 0x5ae   : >> { %v915_v3 = vpop.permute.xlu1 %914 }
 0x5af   : >> { %918 = vst.msk [vmem:[#allocation3] sm:$0xff] %vm917_vm6, %v915_v3 }
 0x5d3   : >> { %v1031_v4 = vpop.permute.xlu0 %1030 }
 0x5d4   : >> { %1034 = vst.msk [vmem:[#allocation3] sm:$0xff] %vm1033_vm7, %v1031_v4 }
 0x5d7   : >> { %v1395_v9 = vpop.permute.xlu0 %1394 }
 0x5d8   : >> { %v1400_v10 = vsel %vm694_vm4, %v1395_v9, 0 }
 0x5db   : >> { %v1147_v5 = vpop.permute.xlu1 %1146  ;;  %v1510_v11 = vpop.permute.xlu0 %1509 }
 0x5dc   : >> { %1150 = vst.msk [vmem:[#allocation3] sm:$0xff] %vm1149_vm8, %v1147_v5  ;;  %v1515_v14 = vsel %vm694_vm4, %v1510_v11, 0 }
 0x5df   : >> { %v1625_v16 = vpop.permute.xlu0 %1624 }
 0x5e0   : >> { %v1630_v20 = vsel %vm694_vm4, %v1625_v16, 0 }
 0x5e3   : >> { %v1151_v6 = vld [vmem:[#allocation3] sm:$0xff] }
 0x5e4   : >> { %v1152_v7 = vpack.c.bf16 %v1151_v6, %v1151_v6 }
 0x5e6   : >> { %2219 = vmatmul.mubr.msk.bf16.vlgmr.msra.gmra.mrb[16].mxu1 %vm614_vm1, %v1152_v7 }
 0x5e7   : >> { %2231 = vmatpush3.bf16.xpose.msra.mxu1 %v1287_v8  ;;  %2232 = vmatprep.mubr.msk.bf16.mxu1 %vm2408_vm3, %v2407_v15  ;;  %v1393_v13 = vpop.permute.xlu1 %1392 }
 0x5e8   : >> { %2242 = vmatprep.subr.bf16.mxu1 %v2407_v15 }
 0x5eb   : >> { %v1508_v19 = vpop.permute.xlu1 %1507 }
 0x5ee   : >> { %2233 = vmatmul.mubr.msk.bf16.vlgmr.msra.gmra.mrb[20].mxu1 %vm694_vm4, %v1282_v1 }
 0x5ef   : >> { %2243 = vmatpush3.bf16.xpose.msra.mxu1 %v1400_v10  ;;  %2244 = vmatprep.mubr.msk.bf16.mxu1 %vm2408_vm3, %v2407_v15  ;;  %v1623_v21 = vpop.permute.xlu1 %1622 }
 0x5f0   : >> { %2254 = vmatprep.subr.bf16.mxu1 %v2407_v15 }
 0x5f6   : >> { %2245 = vmatmul.mubr.msk.bf16.vlgmr.msra.gmra.mrb[24].mxu1 %vm694_vm4, %v1393_v13 }
 0x5f7   : >> { %2255 = vmatpush3.bf16.xpose.msra.mxu1 %v1515_v14  ;;  %2256 = vmatprep.mubr.msk.bf16.mxu1 %vm2408_vm3, %v2407_v15 }
 0x5f8   : >> { %2266 = vmatprep.subr.bf16.mxu1 %v2407_v15 }
 0x5fe   : >> { %2257 = vmatmul.mubr.msk.bf16.vlgmr.msra.gmra.mrb[28].mxu1 %vm694_vm4, %v1508_v19 }
 0x5ff   : >> { %2267 = vmatpush3.bf16.xpose.msra.mxu1 %v1630_v20  ;;  %2268 = vmatprep.mubr.msk.bf16.mxu1 %vm2408_vm3, %v2407_v15 }
 0x600   : >> { %2278 = vmatprep.subr.bf16.mxu1 %v2407_v15 }
 0x606   : >> { %2269 = vmatmul.mubr.msk.bf16.vlgmr.msra.gmra.mrb[32].mxu1 %vm694_vm4, %v1623_v21 }
 0x607   : >> { %2282 = vmatprep.mubr.msk.bf16.mxu1 %vm2408_vm3, %v2407_v15 }
 0x6b9   : >> { %v2709_v22 = vpop.f32.mrb[16].mxu1 }
 0x6ba   : >> { %v2220_v23 = vpop.f32.mrb[17].mxu1 }
 0x6bb   : >> { %v1216_v25 = vpop.f32.mrb[18].mxu1 }
 0x6bc   : >> { %v2221_v26 = vpop.f32.mrb[19].mxu1 }
 0x6c1   : >> { %v1323_v27 = vpop.f32.mrb[20].mxu1 }
 0x6c2   : >> { %v2234_v28 = vpop.f32.mrb[21].mxu1  ;;  %v1329_v24 = vsel %vm694_vm4, %v1323_v27, -inf }
 0x6c3   : >> { %1330 = vmax.xlane.f32.xlu0 %v1329_v24  ;;  %v1326_v29 = vpop.f32.mrb[22].mxu1 }
 0x6c4   : >> { %v2235_v30 = vpop.f32.mrb[23].mxu1 }
 0x6c9   : >> { %v1436_v31 = vpop.f32.mrb[24].mxu1 }
 0x6ca   : >> { %v1442_v32 = vsel %vm694_vm4, %v1436_v31, -inf  ;;  %v2246_v33 = vpop.f32.mrb[25].mxu1 }
 0x6cb   : >> { %1443 = vmax.xlane.f32.xlu1 %v1442_v32  ;;  %v1439_v34 = vpop.f32.mrb[26].mxu1 }
 0x6cc   : >> { %v2247_v35 = vpop.f32.mrb[27].mxu1 }
 0x6d1   : >> { %v1551_v36 = vpop.f32.mrb[28].mxu1 }
 0x6d2   : >> { %v1557_v37 = vsel %vm694_vm4, %v1551_v36, -inf  ;;  %v2258_v38 = vpop.f32.mrb[29].mxu1 }
 0x6d3   : >> { %1558 = vmax.xlane.f32.xlu0 %v1557_v37  ;;  %v1554_v39 = vpop.f32.mrb[30].mxu1  ;;  %v2349_v38 = vld [vmem:[%s2825_s10] sm:$0xff]  }
 0x6d4   : >> { %v2259_v40 = vpop.f32.mrb[31].mxu1  ;;  %2279 = vmatpush3.bf16.msra.mxu1 %v2349_v38  ;;  %v2350_v39 = vld [vmem:[%s2825_s10 + $0x8] sm:$0xff]  }
 0x6d5   : >> { %2280 = vmatprep.subr.bf16.mxu1 %v2407_v15 }
 0x6d8   : >> { %2281 = vmatpush3.bf16.msra.mxu1 %v2350_v39 }
 0x6d9   : >> { %v1666_v41 = vpop.f32.mrb[32].mxu1  ;;  %2294 = vmatprep.subr.bf16.mxu1 %v2407_v15 }
 0x6da   : >> { %v1672_v42 = vsel %vm694_vm4, %v1666_v41, -inf  ;;  %v2270_v43 = vpop.f32.mrb[33].mxu1 }
 0x6db   : >> { %1673 = vmax.xlane.f32.xlu0 %v1672_v42  ;;  %v1669_v44 = vpop.f32.mrb[34].mxu1 }
 0x6dc   : >> { %v2271_v45 = vpop.f32.mrb[35].mxu1 }
 0x750   : >> { %v1331_v46 = vpop.xlane.xlu0 %1330 }
 0x751   : >> { %v1332_v47 = vsub.f32 %v1323_v27, %v1331_v46 }
 0x753   : >> { %v1333_v48 = vmul.f32 1.442695, %v1332_v47 }
 0x755   : >> { %2373 = vpow2.f32 %v1333_v48 }
 0x758   : >> { %v1444_v49 = vpop.xlane.xlu1 %1443 }
 0x759   : >> { %v1445_v50 = vsub.f32 %v1436_v31, %v1444_v49 }
 0x75b   : >> { %v1446_v18 = vmul.f32 1.442695, %v1445_v50 }
 0x75d   : >> { %2375 = vpow2.f32 %v1446_v18 }
 0x75f   : >> { %v2374_v51 = vpop.eup %2373 }
 0x760   : >> { %v1335_v52 = vsel %vm694_vm4, %v2374_v51, 0.0  ;;  %v1559_v53 = vpop.xlane.xlu0 %1558 }
 0x761   : >> { %1336 = vadd.xlane.f32.xlu1 %v1335_v52  ;;  %v1560_v61 = vsub.f32 %v1551_v36, %v1559_v53  ;;  %v2351_v52 = vld [vmem:[%s2827_s12] sm:$0xff]   ;;  %v2352_v53 = vld [vmem:[%s2827_s12 + $0x8] sm:$0xff]  }
 0x763   : >> { %v1561_v62 = vmul.f32 1.442695, %v1560_v61 }
 0x767   : >> { %v2376_v54 = vpop.eup %2375 }
 0x768   : >> { %v1674_v55 = vpop.xlane.xlu0 %1673  ;;  %v1448_v56 = vsel %vm694_vm4, %v2376_v54, 0.0 }
 0x769   : >> { %v1675_v57 = vsub.f32 %v1666_v41, %v1674_v55  ;;  %1449 = vadd.xlane.f32.xlu0 %v1448_v56  ;;  %v2354_v55 = vld [vmem:[%s2829_s14 + $0x8] sm:$0xff]   ;;  %v2060_v56 = vld [vmem:[%s2820_s5] ss:$0 sm:$0xff] }
 0x76b   : >> { %v1676_v58 = vmul.f32 1.442695, %v1675_v57  ;;  %v1214_v57 = vadd.f32 %v2060_v56, %v2709_v22  ;;  %v2355_v22 = vld [vmem:[%s2829_s14 + $0x10] sm:$0xff]  }
 0x76d   : >> { %2377 = vpow2.f32 %v1676_v58  ;;  %v2076_v58 = vld [vmem:[%s2826_s11] ss:$0 sm:$0xff] }
 0x76e   : >> { %2379 = vpow2.f32 %v1561_v62 }
 0x772   : >> { %1342 = vrot.lane.b32.xlu1 %v2543_v12, %s2410_s24 }
 0x777   : >> { %v2378_v59 = vpop.eup %2377 }
 0x778   : >> { %v1678_v60 = vsel %vm694_vm4, %v2378_v59, 0.0  ;;  %v2380_v63 = vpop.eup %2379 }
 0x779   : >> { %1679 = vadd.xlane.f32.xlu0 %v1678_v60  ;;  %v1563_v0 = vsel %vm694_vm4, %v2380_v63, 0.0 }
 0x78f   : >> { %1454 = vrot.lane.b32.xlu0 %v2543_v12, %s2412_s22  ;;  %s2836_s22 = scalar_lea.vmem (%p618_p4), %s2831_s16, %s2525_s29 }
 0x796   : >> { %1564 = vadd.xlane.f32.xlu1 %v1563_v0 }
 0x7a7   : >> { %1569 = vrot.lane.b32.xlu1 %v2543_v12, %s2411_s25 }
 0x7ab   : >> { %1684 = vrot.lane.b32.xlu1 %v2543_v12, %s2835_s23 }
 0x7ee   : >> { %v1337_v1 = vpop.xlane.xlu1 %1336 }
 0x7ef   : >> { %2381 = vrcp.f32 %v1337_v1 }
 0x7f2   : >> { %v1343_v2 = vpop.permute.xlu1 %1342 }
 0x7f3   : >> { %v1348_v3 = vsel %vm758_vm5, %v1343_v2, 0 }
 0x7f4   : >> { %2237 = vmatpush3.bf16.msra.mxu0 %v1348_v3 }
 0x7f5   : >> { %2248 = vmatprep.subr.bf16.mxu0 %v2407_v15 }
 0x7f6   : >> { %v1450_v5 = vpop.xlane.xlu0 %1449 }
 0x7f7   : >> { %2383 = vrcp.f32 %v1450_v5  ;;  %v2356_v5 = vld [vmem:[%s2829_s14 + $0x18] sm:$0xff]  }
 0x7f9   : >> { %v2382_v4 = vpop.eup %2381 }
 0x7fa   : >> { %v1339_v6 = vmul.f32 %v2382_v4, %v2374_v51 }
 0x7fc   : >> { %v1340_v7 = vpack.c.bf16 %v1339_v6, %v1339_v6 }
 0x7fe   : >> { %2239 = vmatmul.mubr.msk.bf16.vlgmr.msra.gmra.mrb[24].mxu0 %vm694_vm4, %v1340_v7 }
 0x7ff   : >> { %2250 = vmatprep.mubr.msk.bf16.mxu0 %vm2408_vm3, %v2407_v15 }
 0x801   : >> { %v2384_v8 = vpop.eup %2383 }
 0x802   : >> { %v1452_v10 = vmul.f32 %v2384_v8, %v2376_v54  ;;  %v2353_v54 = vld [vmem:[%s2829_s14] sm:$0xff]  }
 0x804   : >> { %v1453_v14 = vpack.c.bf16 %v1452_v10, %v1452_v10 }
 0x806   : >> { %v1680_v9 = vpop.xlane.xlu0 %1679 }
 0x80a   : >> { %v1455_v11 = vpop.permute.xlu0 %1454 }
 0x80b   : >> { %v1460_v13 = vsel %vm758_vm5, %v1455_v11, 0 }
 0x80c   : >> { %2249 = vmatpush3.bf16.msra.mxu0 %v1460_v13 }
 0x80d   : >> { %2260 = vmatprep.subr.bf16.mxu0 %v2407_v15 }
 0x80f   : >> { %2251 = vmatmul.mubr.msk.bf16.vlgmr.msra.gmra.mrb[28].mxu0 %vm694_vm4, %v1453_v14 }
 0x810   : >> { %2262 = vmatprep.mubr.msk.bf16.mxu0 %vm2408_vm3, %v2407_v15 }
 0x823   : >> { %v1565_v16 = vpop.xlane.xlu1 %1564 }
 0x824   : >> { %2385 = vrcp.f32 %v1565_v16 }
 0x825   : >> { %2387 = vrcp.f32 %v1680_v9 }
 0x827   : >> { %v1570_v19 = vpop.permute.xlu1 %1569 }
 0x828   : >> { %v1575_v20 = vsel %vm758_vm5, %v1570_v19, 0 }
 0x829   : >> { %2261 = vmatpush3.bf16.msra.mxu0 %v1575_v20 }
 0x82a   : >> { %2272 = vmatprep.subr.bf16.mxu0 %v2407_v15 }
 0x82b   : >> { %v1685_v23 = vpop.permute.xlu1 %1684 }
 0x82c   : >> { %v1690_v27 = vsel %vm758_vm5, %v1685_v23, 0 }
 0x82e   : >> { %v2386_v21 = vpop.eup %2385 }
 0x82f   : >> { %v1567_v25 = vmul.f32 %v2386_v21, %v2380_v63  ;;  %v2388_v28 = vpop.eup %2387 }
 0x830   : >> { %v1682_v24 = vmul.f32 %v2388_v28, %v2378_v59  ;;  %v1805_v59 = vmul.f32 0.5, %v1214_v57 }
 0x831   : >> { %v1568_v26 = vpack.c.bf16 %v1567_v25, %v1567_v25 }
 0x832   : >> { %v1683_v29 = vpack.c.bf16 %v1682_v24, %v1682_v24  ;;  %v1806_v0 = vadd.f32 %v1805_v59, %v2560_v17  ;;  %v2080_v17 = vld [vmem:[%s2828_s13] ss:$0 sm:$0xff] }
 0x833   : >> { %2263 = vmatmul.mubr.msk.bf16.vlgmr.msra.gmra.mrb[32].mxu0 %vm694_vm4, %v1568_v26 }
 0x834   : >> { %2273 = vmatpush3.bf16.msra.mxu0 %v1690_v27  ;;  %2274 = vmatprep.mubr.msk.bf16.mxu0 %vm2408_vm3, %v2407_v15 }
 0x835   : >> { %2286 = vmatprep.subr.bf16.mxu0 %v2407_v15 }
 0x83b   : >> { %2275 = vmatmul.mubr.msk.bf16.vlgmr.msra.gmra.mrb[36].mxu0 %vm694_vm4, %v1683_v29 }
 0x83c   : >> { %2290 = vmatprep.mubr.msk.bf16.mxu0 %vm2408_vm3, %v2407_v15  ;;  %2287 = vmatpush3.bf16.msra.mxu0 %v2351_v52 }
 0x83d   : >> { %2288 = vmatprep.subr.bf16.mxu0 %v2407_v15 }
 0x840   : >> { %2289 = vmatpush3.bf16.msra.mxu0 %v2352_v53 }
 0x8d1   : >> { %v1384_v30 = vpop.f32.mrb[24].mxu0 }
 0x8d2   : >> { %1390 = vst.msk [vmem:[#allocation3] sm:$0xff] %vm694_vm4, %v1384_v30  ;;  %v2240_v31 = vpop.f32.mrb[25].mxu0 }
 0x8d3   : >> { %v1387_v32 = vpop.f32.mrb[26].mxu0 }
 0x8d4   : >> { %v2241_v33 = vpop.f32.mrb[27].mxu0 }
 0x8e2   : >> { %v1496_v34 = vpop.f32.mrb[28].mxu0 }
 0x8e3   : >> { %1503 = vrot.lane.b32.xlu0 %v1496_v34, %s2420_s17  ;;  %v2252_v35 = vpop.f32.mrb[29].mxu0 }
 0x8e4   : >> { %v1499_v36 = vpop.f32.mrb[30].mxu0 }
 0x8e5   : >> { %v2253_v37 = vpop.f32.mrb[31].mxu0 }
 0x906   : >> { %v1611_v40 = vpop.f32.mrb[32].mxu0 }
 0x907   : >> { %1618 = vrot.lane.b32.xlu1 %v1611_v40, %s2421_s27  ;;  %v2264_v41 = vpop.f32.mrb[33].mxu0 }
 0x908   : >> { %v1614_v42 = vpop.f32.mrb[34].mxu0 }
 0x909   : >> { %v2265_v43 = vpop.f32.mrb[35].mxu0 }
 0x90e   : >> { %v1726_v44 = vpop.f32.mrb[36].mxu0 }
 0x90f   : >> { %1733 = vrot.lane.b32.xlu0 %v1726_v44, %s2422_s18  ;;  %v2276_v45 = vpop.f32.mrb[37].mxu0 }
 0x910   : >> { %v1729_v46 = vpop.f32.mrb[38].mxu0 }
 0x911   : >> { %v2277_v47 = vpop.f32.mrb[39].mxu0 }
 0x955   : >> { %v1504_v48 = vpop.permute.xlu0 %1503 }
 0x956   : >> { %1506 = vst.msk [vmem:[#allocation3] sm:$0xff] %vm917_vm6, %v1504_v48 }
 0x979   : >> { %v1619_v49 = vpop.permute.xlu1 %1618 }
 0x97a   : >> { %1621 = vst.msk [vmem:[#allocation3] sm:$0xff] %vm1033_vm7, %v1619_v49 }
 0x981   : >> { %v1734_v50 = vpop.permute.xlu0 %1733 }
 0x982   : >> { %1736 = vst.msk [vmem:[#allocation3] sm:$0xff] %vm1149_vm8, %v1734_v50 }
 0x989   : >> { %v1737_v18 = vld [vmem:[#allocation3] sm:$0xff] }
 0x98a   : >> { %v1738_v51 = vpack.c.bf16 %v1737_v18, %v1737_v18 }
 0x98c   : >> { %2283 = vmatmul.mubr.msk.bf16.vlgmr.msra.gmra.mrb[36].mxu1 %vm614_vm1, %v1738_v51 }
 0x98d   : >> { %2302 = vmatprep.mubr.msk.bf16.mxu1 %vm2408_vm3, %v2407_v15  ;;  %2295 = vmatpush3.bf16.msra.mxu1 %v2353_v54 }
 0x98e   : >> { %2296 = vmatprep.subr.bf16.mxu1 %v2407_v15 }
 0x991   : >> { %2297 = vmatpush3.bf16.msra.mxu1 %v2354_v55 }
 0x992   : >> { %2298 = vmatprep.subr.bf16.mxu1 %v2407_v15 }
 0x995   : >> { %2299 = vmatpush3.bf16.msra.mxu1 %v2355_v22 }
 0x996   : >> { %2300 = vmatprep.subr.bf16.mxu1 %v2407_v15  ;;  %v2084_v15 = vld [vmem:[%s2830_s15] ss:$0 sm:$0xff] }
 0x999   : >> { %2301 = vmatpush3.bf16.msra.mxu1 %v2356_v5 }
 0xa5f   : >> { %v1799_v60 = vpop.f32.mrb[36].mxu1 }
 0xa60   : >> { %v1800_v61 = vadd.f32 %v2076_v58, %v1799_v60  ;;  %v2284_v62 = vpop.f32.mrb[37].mxu1 }
 0xa61   : >> { %v1802_v63 = vpop.f32.mrb[38].mxu1 }
 0xa62   : >> { %v1807_v1 = vmul.f32 0.5, %v1800_v61  ;;  %v2285_v2 = vpop.f32.mrb[39].mxu1 }
 0xa64   : >> { %v1808_v3 = vadd.f32 %v1807_v1, %v1806_v0 }
 0xa66   : >> { %v1809_v4 = vpack.c.bf16 %v1808_v3, %v1808_v3 }
 0xa68   : >> { %2291 = vmatmul.mubr.msk.bf16.vlgmr.msra.gmra.mrb[40].mxu0 %vm614_vm1, %v1809_v4 }
 0xb3b   : >> { %v1870_v6 = vpop.f32.mrb[40].mxu0 }
 0xb3c   : >> { %v1871_v7 = vadd.f32 %v2080_v17, %v1870_v6  ;;  %v2292_v8 = vpop.f32.mrb[41].mxu0 }
 0xb3d   : >> { %v1873_v9 = vpop.f32.mrb[42].mxu0 }
 0xb3e   : >> { %v1876_v10 = vmax.f32 %v1871_v7, 0.0  ;;  %v2293_v11 = vpop.f32.mrb[43].mxu0 }
 0xb40   : >> { %v1877_v13 = vpack.c.bf16 %v1876_v10, %v1876_v10 }
 0xb42   : >> { %2303 = vmatmul.mubr.msk.bf16.vlgmr.msra.gmra.mrb[40].mxu1 %vm1917_vm9, %v1877_v13 }
 0xc14   : > { %620 = sbr.rel (!%p618_p4) target bundleno = 235 (0xeb), region = 124 }
 0xc15   : >> { %v1955_v14 = vpop.f32.mrb[40].mxu1 }
 0xc16   : >> { %v1956_v16 = vadd.f32 %v2084_v15, %v1955_v14  ;;  %v2304_v19 = vpop.f32.mrb[41].mxu1 }
 0xc17   : >> { %v1958_v20 = vpop.f32.mrb[42].mxu1 }
 0xc18   : >> { %v1961_v21 = vadd.f32 %v1956_v16, %v1808_v3  ;;  %v2305_v23 = vpop.f32.mrb[43].mxu1 }
 0xc1a   : >> { %1962 = vst.msk [vmem:[#allocation2] sm:$0xff] %vm614_vm1, %v1961_v21 }
 0xc21   : > { %v1963_v25 = vld [vmem:[#allocation2] sm:$0xff] }
 0xc22   : > { %1964 = vst.msk [vmem:[%s2836_s22] sm:$0xff] %vm614_vm1, %v1963_v25 }
 0xc23 PF: > { %s26_s21 = sadd.s32 1, %s2399_s21  }
 0xc24   : > { %p23_p5 = scmp.ge.s32.totalorder %s26_s21, 4  }
 0xc26   :  { %25 = sbr.rel (!%p23_p5) target bundleno = 2 (0x2), region = 135 }

</bundles_post_ra>
